<compile_context>
chip_gen: v7x
topology: tpu7x:2x2x1
jax: 0.10.0
libtpu: 0.0.40
codegen_flags: <defaults>
</compile_context>

<pallas_src>
import functools

import jax
import jax.numpy as jnp
from jax.experimental import pallas as pl
from jax.experimental.pallas import tpu as pltpu


def _sigmoid(z):
    # Computed in f32 everywhere it is used (bounded / overflow-safe).
    return 1.0 / (1.0 + jnp.exp(-z))


# ----------------------------------------------------------------------------
# The fused block kernel: one grid step == `block_n` images.
# Activations are (C, H*W): channels on sublanes, flattened spatial on lanes.
# ----------------------------------------------------------------------------
def _csp_block_kernel(x_ref, row_ref, col_ref, *rest,
                      treedef, h, w_img, cbam_k, block_n, compute_dtype):
    o_ref = rest[-1]
    p = jax.tree_util.tree_unflatten(treedef, rest[:-1])

    hw = h * w_img
    ct = compute_dtype

    # Boundary masks: built once per grid step from the prefetched row/col
    # coordinate vectors (i32 (1,HW)), cached and reused by every conv/tap.
    row = row_ref[...]
    col = col_ref[...]
    mask_cache = {}

    def get_mask(oy, ox):
        if oy == 0 and ox == 0:
            return None
        key = (oy, ox)
        if key not in mask_cache:
            valid = None
            if oy > 0:
                valid = row < h - oy
            elif oy < 0:
                valid = row >= -oy
            if ox > 0:
                c_ok = col < w_img - ox
                valid = c_ok if valid is None else valid & c_ok
            elif ox < 0:
                c_ok = col >= -ox
                valid = c_ok if valid is None else valid & c_ok
            mask_cache[key] = valid.astype(ct)
        return mask_cache[key]

    def cbr_1x1(xin, wb, act=True):
        w_ref, b_ref = wb
        y = jnp.dot(w_ref[...], xin, preferred_element_type=jnp.float32)
        y = y + b_ref[...]
        return jnp.maximum(y, 0.0) if act else y

    def cbr_kxk(xin, wb, kh, kw, dil, act=True):
        """'same' kh x kw conv (stride 1, pad dil*(k//2)) as ONE MXU matmul.

        Shifted (pltpu.roll, XLU) + boundary-masked views of the VMEM-resident
        tile are stacked along the contraction axis -> (kh*kw*Cin, HW); the
        weight was packed as (Cout, kh*kw*Cin) with matching (ky, kx, cin)
        ordering in the wrapper.
        """
        w_ref, b_ref = wb
        pad_h = dil * (kh // 2)
        pad_w = dil * (kw // 2)
        taps = []
        for ky in range(kh):
            for kx in range(kw):
                oy = ky * dil - pad_h
                ox = kx * dil - pad_w
                d = oy * w_img + ox                      # s[:, i] = x[:, i + d]
                if d == 0:
                    tap = xin
                else:
                    # XLU lane rotation; wrapped lanes are zeroed by the mask.
                    tap = pltpu.roll(xin, shift=(-d) % hw, axis=1)
                m = get_mask(oy, ox)
                if m is not None:
                    tap = tap * m
                taps.append(tap)
        xk = taps[0] if len(taps) == 1 else jnp.concatenate(taps, axis=0)
        y = jnp.dot(w_ref[...], xk, preferred_element_type=jnp.float32)
        y = y + b_ref[...]
        return jnp.maximum(y, 0.0) if act else y

    for b in range(block_n):
        x = x_ref[b]                                     # (C_in, HW), compute dtype

        # Branch entry 1x1s take the full x (weights zero-padded to K = C_in);
        # no sublane-misaligned channel slicing in-kernel.
        # m[0]: 1x1
        y0 = cbr_1x1(x, p["m0"]["c0"]).astype(ct)

        # m[1]: 1x1 -> 3x3 -> 1x1
        t = cbr_1x1(x, p["m1"]["c0"]).astype(ct)
        t = cbr_kxk(t, p["m1"]["c1"], 3, 3, 1).astype(ct)
        y1 = cbr_1x1(t, p["m1"]["c2"]).astype(ct)

        # m[2]: 1x1 -> 3x3 (dilation=2) -> 1x1
        t = cbr_1x1(x, p["m2"]["c0"]).astype(ct)
        t = cbr_kxk(t, p["m2"]["c1"], 3, 3, 2).astype(ct)
        y2 = cbr_1x1(t, p["m2"]["c2"]).astype(ct)

        # m[3]: 1x1 -> 1x3 -> 3x1 -> 1x1
        t = cbr_1x1(x, p["m3"]["c0"]).astype(ct)
        t = cbr_kxk(t, p["m3"]["c1"], 1, 3, 1).astype(ct)
        t = cbr_kxk(t, p["m3"]["c2"], 3, 1, 1).astype(ct)
        y3 = cbr_1x1(t, p["m3"]["c3"]).astype(ct)

        # Final 1x1 fuse, accumulated per branch (no sublane concat; each y_i
        # dies right after its contribution is added).
        wf0, wf1, wf2, wf3, bfin = p["final"]
        y = jnp.dot(wf0[...], y0, preferred_element_type=jnp.float32)
        y = y + jnp.dot(wf1[...], y1, preferred_element_type=jnp.float32)
        y = y + jnp.dot(wf2[...], y2, preferred_element_type=jnp.float32)
        y = y + jnp.dot(wf3[...], y3, preferred_element_type=jnp.float32)
        y = y + bfin[...]                                # (C_out, HW) f32

        # ---- CBAM: channel attention then spatial attention (f32 math) ----
        w1_ref, b1_ref = p["cbam"]["ch1"]
        w2_ref, b2_ref = p["cbam"]["ch2"]

        avg = jnp.mean(y, axis=1, keepdims=True)         # (C, 1)
        mxp = jnp.max(y, axis=1, keepdims=True)          # (C, 1)

        def mlp(v):
            hdn = jnp.maximum(
                jnp.dot(w1_ref[...], v, preferred_element_type=jnp.float32)
                + b1_ref[...], 0.0)
            return (jnp.dot(w2_ref[...], hdn, preferred_element_type=jnp.float32)
                    + b2_ref[...])

        y = y * _sigmoid(mlp(avg) + mlp(mxp))            # channel attention

        s_avg = jnp.mean(y, axis=0, keepdims=True)       # (1, HW)
        s_max = jnp.max(y, axis=0, keepdims=True)        # (1, HW)
        s = jnp.concatenate([s_avg, s_max], axis=0).astype(ct)     # (2, HW)
        sa = cbr_kxk(s, p["cbam"]["sp"], cbam_k, cbam_k, 1, act=False)  # (1,HW)
        y = y * _sigmoid(sa)                             # spatial attention

        o_ref[b] = jnp.maximum(x.astype(jnp.float32) + y, 0.0).astype(o_ref.dtype)


# ----------------------------------------------------------------------------
# Wrapper: pack weights into kernel-ready layouts and launch one pallas_call.
# ----------------------------------------------------------------------------
def _pack_params(params, *, in_c, t_c, compute_dtype):
    ct = compute_dtype

    def conv_1x1(wb, pad_branch=None):
        w, b = wb
        o = w.shape[0]
        w2 = w.reshape(o, w.shape[1])
        if pad_branch is not None:
            # Embed the (o, t_c) weight into (o, in_c) zeros so the branch
            # entry conv can consume the full (C_in, HW) activation directly.
            wz = jnp.zeros((o, in_c), w2.dtype)
            w2 = wz.at[:, pad_branch * t_c:(pad_branch + 1) * t_c].set(w2)
        return (w2.astype(ct), b.reshape(o, 1).astype(jnp.float32))

    def conv_kxk(wb):
        w, b = wb
        o, i, kh, kw = w.shape
        # (O,I,kh,kw) -> (O, kh*kw*I): column order (ky, kx, cin) matches the
        # tap-stacking order in the kernel.
        wk = jnp.transpose(w, (0, 2, 3, 1)).reshape(o, kh * kw * i)
        return (wk.astype(ct), b.reshape(o, 1).astype(jnp.float32))

    wfin, bfin = params["final"]
    out_c = wfin.shape[0]
    wfin2 = wfin.reshape(out_c, in_c)
    final = tuple(wfin2[:, i * t_c:(i + 1) * t_c].astype(ct) for i in range(4))
    final = final + (bfin.reshape(out_c, 1).astype(jnp.float32),)

    w1, b1 = params["cbam"]["ch1"]
    w2, b2 = params["cbam"]["ch2"]

    return {
        "m0": {"c0": conv_1x1(params["m0"]["c0"], pad_branch=0)},
        "m1": {"c0": conv_1x1(params["m1"]["c0"], pad_branch=1),
               "c1": conv_kxk(params["m1"]["c1"]),
               "c2": conv_1x1(params["m1"]["c2"])},
        "m2": {"c0": conv_1x1(params["m2"]["c0"], pad_branch=2),
               "c1": conv_kxk(params["m2"]["c1"]),
               "c2": conv_1x1(params["m2"]["c2"])},
        "m3": {"c0": conv_1x1(params["m3"]["c0"], pad_branch=3),
               "c1": conv_kxk(params["m3"]["c1"]),
               "c2": conv_kxk(params["m3"]["c2"]),
               "c3": conv_1x1(params["m3"]["c3"])},
        "final": final,
        "cbam": {
            # Channel-attention MLP operands are tiny (C,1); keep them f32.
            "ch1": (w1.reshape(w1.shape[0], w1.shape[1]).astype(jnp.float32),
                    b1.reshape(-1, 1).astype(jnp.float32)),
            "ch2": (w2.reshape(w2.shape[0], w2.shape[1]).astype(jnp.float32),
                    b2.reshape(-1, 1).astype(jnp.float32)),
            "sp": conv_kxk(params["cbam"]["sp"]),
        },
    }


@functools.partial(jax.jit, static_argnames=("compute_dtype",))
def csp_cat_bottle_block_v2(x_nchw, params, compute_dtype=jnp.bfloat16):
    n, c, h, w = x_nchw.shape
    hw = h * w
    assert c % 4 == 0, "in_c must be divisible by 4 (torch.chunk(x, 4, 1))"
    t_c = c // 4
    out_c = params["final"][0].shape[0]
    assert out_c == c, "residual relu(x + y) requires out_c == in_c"

    kparams = _pack_params(params, in_c=c, t_c=t_c, compute_dtype=compute_dtype)
    leaves, treedef = jax.tree_util.tree_flatten(kparams)

    # Per-lane spatial coordinates (precomputed: no i32 vector div/mod
    # in-kernel); masks are derived from them once per grid step and cached.
    pos = jnp.arange(hw, dtype=jnp.int32)
    row = (pos // w).reshape(1, hw)
    col = (pos % w).reshape(1, hw)

    # Images per grid step: amortize the per-step overhead for small images
    # while keeping >= 2 parallel grid steps (both v7x TensorCores busy).
    block_n = 1
    if hw <= 2048:
        for cand in range(min(n, 8), 0, -1):
            if n % cand == 0 and (n // cand) >= min(2, n):
                block_n = cand
                break
    grid_n = n // block_n

    kernel = functools.partial(
        _csp_block_kernel, treedef=treedef, h=h, w_img=w, cbam_k=3,
        block_n=block_n, compute_dtype=compute_dtype)

    in_specs = [
        pl.BlockSpec((block_n, c, hw), lambda i: (i, 0, 0)),    # x images
        pl.BlockSpec((1, hw), lambda i: (0, 0)),                # row coords
        pl.BlockSpec((1, hw), lambda i: (0, 0)),                # col coords
    ]
    in_specs += [pl.BlockSpec(l.shape, lambda i: (0, 0)) for l in leaves]

    # VMEM budget: double-buffered I/O blocks + resident weights + headroom
    # for the live (C, HW) intermediates / stacked k*k tap matrices.
    itemsize = jnp.dtype(compute_dtype).itemsize
    hide_c = params["m1"]["c0"][0].shape[0]
    live_c = max(c, out_c, 9 * hide_c)
    est = (2 * block_n * c * hw * itemsize
           + 2 * block_n * out_c * hw * x_nchw.dtype.itemsize
           + sum(int(l.size) * l.dtype.itemsize for l in leaves)
           + 16 * block_n * live_c * hw * 4)
    vmem_limit = int(min(64 * 1024 * 1024, max(32 * 1024 * 1024, 2 * est)))

    out_flat = pl.pallas_call(
        kernel,
        out_shape=jax.ShapeDtypeStruct((n, out_c, hw), x_nchw.dtype),
        grid_spec=pl.GridSpec(
            grid=(grid_n,),
            in_specs=in_specs,
            out_specs=pl.BlockSpec((block_n, out_c, hw), lambda i: (i, 0, 0)),
        ),
        compiler_params=pltpu.CompilerParams(
            dimension_semantics=("parallel",),
            vmem_limit_bytes=vmem_limit,
        ),
    )(x_nchw.reshape(n, c, hw).astype(compute_dtype), row, col, *leaves)

    return out_flat.reshape(n, out_c, h, w)


# ----------------------------------------------------------------------------
# Deterministic parameter construction (BN folded into conv weight/bias).
# ----------------------------------------------------------------------------
def _init_cbr(key, in_c, out_c, kh, kw):
    k_w, k_g, k_b, k_m, k_v = jax.random.split(key, 5)
    wgt = 0.1 * jax.random.normal(k_w, (out_c, in_c, kh, kw), jnp.float32)  # OIHW
    gamma = 1.0 + 0.1 * jax.random.normal(k_g, (out_c,), jnp.float32)
    beta = 0.1 * jax.random.normal(k_b, (out_c,), jnp.float32)
    mean = 0.1 * jax.random.normal(k_m, (out_c,), jnp.float32)
    var = 1.0 + 0.1 * jnp.abs(jax.random.normal(k_v, (out_c,), jnp.float32))
    scale = gamma / jnp.sqrt(var + 1e-5)
    return (wgt * scale[:, None, None, None], beta - mean * scale)


def _init_conv(key, in_c, out_c, kh, kw):
    k1, k2 = jax.random.split(key)
    wgt = 0.1 * jax.random.normal(k1, (out_c, in_c, kh, kw), jnp.float32)
    b = 0.1 * jax.random.normal(k2, (out_c,), jnp.float32)
    return (wgt, b)


def init_csp_cat_bottle_block_v2(key, in_c, hide_c, out_c):
    t_c = in_c // 4
    keys = iter(jax.random.split(key, 16))
    return {
        "m0": {"c0": _init_cbr(next(keys), t_c, t_c, 1, 1)},
        "m1": {"c0": _init_cbr(next(keys), t_c, hide_c, 1, 1),
               "c1": _init_cbr(next(keys), hide_c, hide_c, 3, 3),
               "c2": _init_cbr(next(keys), hide_c, t_c, 1, 1)},
        "m2": {"c0": _init_cbr(next(keys), t_c, hide_c, 1, 1),
               "c1": _init_cbr(next(keys), hide_c, hide_c, 3, 3),
               "c2": _init_cbr(next(keys), hide_c, t_c, 1, 1)},
        "m3": {"c0": _init_cbr(next(keys), t_c, hide_c, 1, 1),
               "c1": _init_cbr(next(keys), hide_c, hide_c, 1, 3),
               "c2": _init_cbr(next(keys), hide_c, hide_c, 3, 1),
               "c3": _init_cbr(next(keys), hide_c, t_c, 1, 1)},
        "final": _init_cbr(next(keys), in_c, out_c, 1, 1),
        "cbam": {"ch1": _init_conv(next(keys), out_c, max(out_c // 4, 1), 1, 1),
                 "ch2": _init_conv(next(keys), max(out_c // 4, 1), out_c, 1, 1),
                 "sp": _init_conv(next(keys), 2, 1, 3, 3)},
    }


# ----------------------------------------------------------------------------
# Pure-JAX reference (lax convolutions) for verification.
# ----------------------------------------------------------------------------
def _ref_cbr(x, wgt, b, *, dilation=(1, 1), act=True):
    _, _, kh, kw = wgt.shape
    pad = ((dilation[0] * (kh // 2),) * 2, (dilation[1] * (kw // 2),) * 2)
    y = jax.lax.conv_general_dilated(
        x, wgt, window_strides=(1, 1), padding=pad, rhs_dilation=dilation,
        dimension_numbers=("NCHW", "OIHW", "NCHW"),
        precision=jax.lax.Precision.HIGHEST)
    y = y + b.reshape(1, -1, 1, 1)
    return jnp.maximum(y, 0.0) if act else y


def _ref_cbam(x, p):
    w1, b1 = p["ch1"]
    w2, b2 = p["ch2"]
    wsp, bsp = p["sp"]
    avg = jnp.mean(x, axis=(2, 3), keepdims=True)
    mx = jnp.max(x, axis=(2, 3), keepdims=True)

    def mlp(v):
        return _ref_cbr(_ref_cbr(v, w1, b1, act=True), w2, b2, act=False)

    x = x * _sigmoid(mlp(avg) + mlp(mx))
    s = jnp.concatenate([jnp.mean(x, axis=1, keepdims=True),
                         jnp.max(x, axis=1, keepdims=True)], axis=1)
    return x * _sigmoid(_ref_cbr(s, wsp, bsp, act=False))


def csp_cat_bottle_block_v2_ref(x, params):
    t_c = x.shape[1] // 4
    x1, x2, x3, x4 = [x[:, i * t_c:(i + 1) * t_c] for i in range(4)]

    y0 = _ref_cbr(x1, *params["m0"]["c0"])

    t = _ref_cbr(x2, *params["m1"]["c0"])
    t = _ref_cbr(t, *params["m1"]["c1"])
    y1 = _ref_cbr(t, *params["m1"]["c2"])

    t = _ref_cbr(x3, *params["m2"]["c0"])
    t = _ref_cbr(t, *params["m2"]["c1"], dilation=(2, 2))
    y2 = _ref_cbr(t, *params["m2"]["c2"])

    t = _ref_cbr(x4, *params["m3"]["c0"])
    t = _ref_cbr(t, *params["m3"]["c1"])
    t = _ref_cbr(t, *params["m3"]["c2"])
    y3 = _ref_cbr(t, *params["m3"]["c3"])

    ycat = jnp.concatenate([y0, y1, y2, y3], axis=1)
    y = _ref_cbr(ycat, *params["final"], act=False)
    y = _ref_cbam(y, params["cbam"])
    return jnp.maximum(x + y, 0.0)


# ----------------------------------------------------------------------------
if __name__ == "__main__":
    # out_c == in_c is required by the residual add; in_c % 4 == 0 by chunk(4).
    in_c, hide_c, out_c = 8, 8, 8
    N, H, W = 2, 16, 16

    kp, kx = jax.random.split(jax.random.PRNGKey(0))
    params = init_csp_cat_bottle_block_v2(kp, in_c, hide_c, out_c)
    x = jax.random.normal(kx, (N, in_c, H, W), jnp.float32)

    ref = jax.block_until_ready(csp_cat_bottle_block_v2_ref(x, params))

    # Exact (f32) compute path: tight numerical check.
    out_f32 = jax.block_until_ready(
        csp_cat_bottle_block_v2(x, params, compute_dtype=jnp.float32))
    assert out_f32.shape == (N, out_c, H, W)
    err32 = float(jnp.max(jnp.abs(out_f32 - ref)))
    assert jnp.allclose(out_f32, ref, rtol=2e-3, atol=2e-3), (
        f"f32 path mismatch vs reference, max abs err = {err32}")

    # bf16 compute path (default; halves HBM traffic, bf16-native MXU on
    # v5e/v6e/v7x).  Accumulation / bias / attention math stay in f32.
    out_bf16 = jax.block_until_ready(
        csp_cat_bottle_block_v2(x, params, compute_dtype=jnp.bfloat16))
    errbf = float(jnp.max(jnp.abs(out_bf16 - ref)))
    assert jnp.allclose(out_bf16, ref, rtol=5e-2, atol=5e-2), (
        f"bf16 path mismatch vs reference, max abs err = {errbf}")

    print("KERNEL_OK")
</pallas_src>

<mosaic_0001>
module attributes {stable_mosaic.version = 11 : i64} {
  func.func @_csp_block_kernel(%arg0: i32, %arg1: memref<1x8x256xf32, #tpu.memory_space<vmem>>, %arg2: memref<1x256xi32, #tpu.memory_space<vmem>>, %arg3: memref<1x256xi32, #tpu.memory_space<vmem>>, %arg4: memref<2x8xf32, #tpu.memory_space<vmem>>, %arg5: memref<2x1xf32, #tpu.memory_space<vmem>>, %arg6: memref<8x2xf32, #tpu.memory_space<vmem>>, %arg7: memref<8x1xf32, #tpu.memory_space<vmem>>, %arg8: memref<1x18xf32, #tpu.memory_space<vmem>>, %arg9: memref<1x1xf32, #tpu.memory_space<vmem>>, %arg10: memref<8x2xf32, #tpu.memory_space<vmem>>, %arg11: memref<8x2xf32, #tpu.memory_space<vmem>>, %arg12: memref<8x2xf32, #tpu.memory_space<vmem>>, %arg13: memref<8x2xf32, #tpu.memory_space<vmem>>, %arg14: memref<8x1xf32, #tpu.memory_space<vmem>>, %arg15: memref<2x8xf32, #tpu.memory_space<vmem>>, %arg16: memref<2x1xf32, #tpu.memory_space<vmem>>, %arg17: memref<8x8xf32, #tpu.memory_space<vmem>>, %arg18: memref<8x1xf32, #tpu.memory_space<vmem>>, %arg19: memref<8x72xf32, #tpu.memory_space<vmem>>, %arg20: memref<8x1xf32, #tpu.memory_space<vmem>>, %arg21: memref<2x8xf32, #tpu.memory_space<vmem>>, %arg22: memref<2x1xf32, #tpu.memory_space<vmem>>, %arg23: memref<8x8xf32, #tpu.memory_space<vmem>>, %arg24: memref<8x1xf32, #tpu.memory_space<vmem>>, %arg25: memref<8x72xf32, #tpu.memory_space<vmem>>, %arg26: memref<8x1xf32, #tpu.memory_space<vmem>>, %arg27: memref<2x8xf32, #tpu.memory_space<vmem>>, %arg28: memref<2x1xf32, #tpu.memory_space<vmem>>, %arg29: memref<8x8xf32, #tpu.memory_space<vmem>>, %arg30: memref<8x1xf32, #tpu.memory_space<vmem>>, %arg31: memref<8x24xf32, #tpu.memory_space<vmem>>, %arg32: memref<8x1xf32, #tpu.memory_space<vmem>>, %arg33: memref<8x24xf32, #tpu.memory_space<vmem>>, %arg34: memref<8x1xf32, #tpu.memory_space<vmem>>, %arg35: memref<2x8xf32, #tpu.memory_space<vmem>>, %arg36: memref<2x1xf32, #tpu.memory_space<vmem>>, %arg37: memref<1x8x256xf32, #tpu.memory_space<vmem>>) attributes {dimension_semantics = [#tpu.dimension_semantics<parallel>], iteration_bounds = array<i64: 2>, scalar_prefetch = 0 : i64, scratch_operands = 0 : i64, tpu.core_type = #tpu.core_type<tc>, window_params = [{transform_indices = @transform_0, window_bounds = array<i64: 1, 8, 256>}, {pipeline_mode = #tpu.pipeline_mode<synchronous>, transform_indices = @transform_1, window_bounds = array<i64: 1, 256>}, {pipeline_mode = #tpu.pipeline_mode<synchronous>, transform_indices = @transform_2, window_bounds = array<i64: 1, 256>}, {pipeline_mode = #tpu.pipeline_mode<synchronous>, transform_indices = @transform_3, window_bounds = array<i64: 2, 8>}, {pipeline_mode = #tpu.pipeline_mode<synchronous>, transform_indices = @transform_4, window_bounds = array<i64: 2, 1>}, {pipeline_mode = #tpu.pipeline_mode<synchronous>, transform_indices = @transform_5, window_bounds = array<i64: 8, 2>}, {pipeline_mode = #tpu.pipeline_mode<synchronous>, transform_indices = @transform_6, window_bounds = array<i64: 8, 1>}, {pipeline_mode = #tpu.pipeline_mode<synchronous>, transform_indices = @transform_7, window_bounds = array<i64: 1, 18>}, {pipeline_mode = #tpu.pipeline_mode<synchronous>, transform_indices = @transform_8, window_bounds = array<i64: 1, 1>}, {pipeline_mode = #tpu.pipeline_mode<synchronous>, transform_indices = @transform_9, window_bounds = array<i64: 8, 2>}, {pipeline_mode = #tpu.pipeline_mode<synchronous>, transform_indices = @transform_10, window_bounds = array<i64: 8, 2>}, {pipeline_mode = #tpu.pipeline_mode<synchronous>, transform_indices = @transform_11, window_bounds = array<i64: 8, 2>}, {pipeline_mode = #tpu.pipeline_mode<synchronous>, transform_indices = @transform_12, window_bounds = array<i64: 8, 2>}, {pipeline_mode = #tpu.pipeline_mode<synchronous>, transform_indices = @transform_13, window_bounds = array<i64: 8, 1>}, {pipeline_mode = #tpu.pipeline_mode<synchronous>, transform_indices = @transform_14, window_bounds = array<i64: 2, 8>}, {pipeline_mode = #tpu.pipeline_mode<synchronous>, transform_indices = @transform_15, window_bounds = array<i64: 2, 1>}, {pipeline_mode = #tpu.pipeline_mode<synchronous>, transform_indices = @transform_16, window_bounds = array<i64: 8, 8>}, {pipeline_mode = #tpu.pipeline_mode<synchronous>, transform_indices = @transform_17, window_bounds = array<i64: 8, 1>}, {pipeline_mode = #tpu.pipeline_mode<synchronous>, transform_indices = @transform_18, window_bounds = array<i64: 8, 72>}, {pipeline_mode = #tpu.pipeline_mode<synchronous>, transform_indices = @transform_19, window_bounds = array<i64: 8, 1>}, {pipeline_mode = #tpu.pipeline_mode<synchronous>, transform_indices = @transform_20, window_bounds = array<i64: 2, 8>}, {pipeline_mode = #tpu.pipeline_mode<synchronous>, transform_indices = @transform_21, window_bounds = array<i64: 2, 1>}, {pipeline_mode = #tpu.pipeline_mode<synchronous>, transform_indices = @transform_22, window_bounds = array<i64: 8, 8>}, {pipeline_mode = #tpu.pipeline_mode<synchronous>, transform_indices = @transform_23, window_bounds = array<i64: 8, 1>}, {pipeline_mode = #tpu.pipeline_mode<synchronous>, transform_indices = @transform_24, window_bounds = array<i64: 8, 72>}, {pipeline_mode = #tpu.pipeline_mode<synchronous>, transform_indices = @transform_25, window_bounds = array<i64: 8, 1>}, {pipeline_mode = #tpu.pipeline_mode<synchronous>, transform_indices = @transform_26, window_bounds = array<i64: 2, 8>}, {pipeline_mode = #tpu.pipeline_mode<synchronous>, transform_indices = @transform_27, window_bounds = array<i64: 2, 1>}, {pipeline_mode = #tpu.pipeline_mode<synchronous>, transform_indices = @transform_28, window_bounds = array<i64: 8, 8>}, {pipeline_mode = #tpu.pipeline_mode<synchronous>, transform_indices = @transform_29, window_bounds = array<i64: 8, 1>}, {pipeline_mode = #tpu.pipeline_mode<synchronous>, transform_indices = @transform_30, window_bounds = array<i64: 8, 24>}, {pipeline_mode = #tpu.pipeline_mode<synchronous>, transform_indices = @transform_31, window_bounds = array<i64: 8, 1>}, {pipeline_mode = #tpu.pipeline_mode<synchronous>, transform_indices = @transform_32, window_bounds = array<i64: 8, 24>}, {pipeline_mode = #tpu.pipeline_mode<synchronous>, transform_indices = @transform_33, window_bounds = array<i64: 8, 1>}, {pipeline_mode = #tpu.pipeline_mode<synchronous>, transform_indices = @transform_34, window_bounds = array<i64: 2, 8>}, {pipeline_mode = #tpu.pipeline_mode<synchronous>, transform_indices = @transform_35, window_bounds = array<i64: 2, 1>}, {transform_indices = @transform_36, window_bounds = array<i64: 1, 8, 256>}]} {
    %c0 = arith.constant 0 : index
    %c0_0 = arith.constant 0 : index
    %0 = vector.load %arg2[%c0, %c0_0] : memref<1x256xi32, #tpu.memory_space<vmem>>, vector<1x256xi32>
    %c0_1 = arith.constant 0 : index
    %c0_2 = arith.constant 0 : index
    %1 = vector.load %arg3[%c0_1, %c0_2] : memref<1x256xi32, #tpu.memory_space<vmem>>, vector<1x256xi32>
    %c0_3 = arith.constant 0 : index
    %c0_4 = arith.constant 0 : index
    %c0_5 = arith.constant 0 : index
    %2 = vector.load %arg1[%c0_3, %c0_4, %c0_5] : memref<1x8x256xf32, #tpu.memory_space<vmem>>, vector<1x8x256xf32>
    %3 = vector.shape_cast %2 : vector<1x8x256xf32> to vector<8x256xf32>
    %c0_6 = arith.constant 0 : index
    %c0_7 = arith.constant 0 : index
    %4 = vector.load %arg15[%c0_6, %c0_7] : memref<2x8xf32, #tpu.memory_space<vmem>>, vector<2x8xf32>
    %cst = arith.constant dense<0.000000e+00> : vector<2x256xf32>
    %5 = tpu.matmul %4, %3, %cst {dimension_numbers = #tpu.dot_dimension_numbers<[1], [0], [0], [1], [0, 0, 1, 1], [], []>} : vector<2x8xf32>, vector<8x256xf32>, vector<2x256xf32> -> vector<2x256xf32>
    %c0_8 = arith.constant 0 : index
    %c0_9 = arith.constant 0 : index
    %6 = vector.load %arg16[%c0_8, %c0_9] : memref<2x1xf32, #tpu.memory_space<vmem>>, vector<2x1xf32>
    %7 = vector.broadcast %6 : vector<2x1xf32> to vector<2x256xf32>
    %8 = arith.addf %5, %7 : vector<2x256xf32>
    %cst_10 = arith.constant 0.000000e+00 : f32
    %9 = vector.broadcast %cst_10 : f32 to vector<2x256xf32>
    %10 = arith.maximumf %8, %9 : vector<2x256xf32>
    %c0_11 = arith.constant 0 : index
    %c0_12 = arith.constant 0 : index
    %11 = vector.load %arg17[%c0_11, %c0_12] : memref<8x8xf32, #tpu.memory_space<vmem>>, vector<8x8xf32>
    %cst_13 = arith.constant dense<0.000000e+00> : vector<8x256xf32>
    %12 = tpu.matmul %11, %3, %cst_13 {dimension_numbers = #tpu.dot_dimension_numbers<[1], [0], [0], [1], [0, 0, 1, 1], [], []>} : vector<8x8xf32>, vector<8x256xf32>, vector<8x256xf32> -> vector<8x256xf32>
    %c0_14 = arith.constant 0 : index
    %c0_15 = arith.constant 0 : index
    %13 = vector.load %arg18[%c0_14, %c0_15] : memref<8x1xf32, #tpu.memory_space<vmem>>, vector<8x1xf32>
    %14 = vector.broadcast %13 : vector<8x1xf32> to vector<8x256xf32>
    %15 = arith.addf %12, %14 : vector<8x256xf32>
    %cst_16 = arith.constant 0.000000e+00 : f32
    %16 = vector.broadcast %cst_16 : f32 to vector<8x256xf32>
    %17 = arith.maximumf %15, %16 : vector<8x256xf32>
    %c17_i32 = arith.constant 17 : i32
    %18 = tpu.dynamic_rotate %17 by %c17_i32 dim 1 : vector<8x256xf32>, i32 -> vector<8x256xf32>
    %c1_i32 = arith.constant 1 : i32
    %19 = vector.broadcast %c1_i32 : i32 to vector<1x256xi32>
    %20 = arith.cmpi sge, %0, %19 : vector<1x256xi32>
    %c1_i32_17 = arith.constant 1 : i32
    %21 = vector.broadcast %c1_i32_17 : i32 to vector<1x256xi32>
    %22 = arith.cmpi sge, %1, %21 : vector<1x256xi32>
    %23 = arith.andi %20, %22 : vector<1x256xi1>
    %24 = arith.extui %23 : vector<1x256xi1> to vector<1x256xi32>
    %25 = arith.sitofp %24 : vector<1x256xi32> to vector<1x256xf32>
    %26 = vector.broadcast %25 : vector<1x256xf32> to vector<8x256xf32>
    %27 = arith.mulf %18, %26 : vector<8x256xf32>
    %c16_i32 = arith.constant 16 : i32
    %28 = tpu.dynamic_rotate %17 by %c16_i32 dim 1 : vector<8x256xf32>, i32 -> vector<8x256xf32>
    %c1_i32_18 = arith.constant 1 : i32
    %29 = vector.broadcast %c1_i32_18 : i32 to vector<1x256xi32>
    %30 = arith.cmpi sge, %0, %29 : vector<1x256xi32>
    %31 = arith.extui %30 : vector<1x256xi1> to vector<1x256xi32>
    %32 = arith.sitofp %31 : vector<1x256xi32> to vector<1x256xf32>
    %33 = vector.broadcast %32 : vector<1x256xf32> to vector<8x256xf32>
    %34 = arith.mulf %28, %33 : vector<8x256xf32>
    %c15_i32 = arith.constant 15 : i32
    %35 = tpu.dynamic_rotate %17 by %c15_i32 dim 1 : vector<8x256xf32>, i32 -> vector<8x256xf32>
    %c1_i32_19 = arith.constant 1 : i32
    %36 = vector.broadcast %c1_i32_19 : i32 to vector<1x256xi32>
    %37 = arith.cmpi sge, %0, %36 : vector<1x256xi32>
    %c15_i32_20 = arith.constant 15 : i32
    %38 = vector.broadcast %c15_i32_20 : i32 to vector<1x256xi32>
    %39 = arith.cmpi slt, %1, %38 : vector<1x256xi32>
    %40 = arith.andi %37, %39 : vector<1x256xi1>
    %41 = arith.extui %40 : vector<1x256xi1> to vector<1x256xi32>
    %42 = arith.sitofp %41 : vector<1x256xi32> to vector<1x256xf32>
    %43 = vector.broadcast %42 : vector<1x256xf32> to vector<8x256xf32>
    %44 = arith.mulf %35, %43 : vector<8x256xf32>
    %c1_i32_21 = arith.constant 1 : i32
    %45 = tpu.dynamic_rotate %17 by %c1_i32_21 dim 1 : vector<8x256xf32>, i32 -> vector<8x256xf32>
    %c1_i32_22 = arith.constant 1 : i32
    %46 = vector.broadcast %c1_i32_22 : i32 to vector<1x256xi32>
    %47 = arith.cmpi sge, %1, %46 : vector<1x256xi32>
    %48 = arith.extui %47 : vector<1x256xi1> to vector<1x256xi32>
    %49 = arith.sitofp %48 : vector<1x256xi32> to vector<1x256xf32>
    %50 = vector.broadcast %49 : vector<1x256xf32> to vector<8x256xf32>
    %51 = arith.mulf %45, %50 : vector<8x256xf32>
    %c255_i32 = arith.constant 255 : i32
    %52 = tpu.dynamic_rotate %17 by %c255_i32 dim 1 : vector<8x256xf32>, i32 -> vector<8x256xf32>
    %c15_i32_23 = arith.constant 15 : i32
    %53 = vector.broadcast %c15_i32_23 : i32 to vector<1x256xi32>
    %54 = arith.cmpi slt, %1, %53 : vector<1x256xi32>
    %55 = arith.extui %54 : vector<1x256xi1> to vector<1x256xi32>
    %56 = arith.sitofp %55 : vector<1x256xi32> to vector<1x256xf32>
    %57 = vector.broadcast %56 : vector<1x256xf32> to vector<8x256xf32>
    %58 = arith.mulf %52, %57 : vector<8x256xf32>
    %c241_i32 = arith.constant 241 : i32
    %59 = tpu.dynamic_rotate %17 by %c241_i32 dim 1 : vector<8x256xf32>, i32 -> vector<8x256xf32>
    %c15_i32_24 = arith.constant 15 : i32
    %60 = vector.broadcast %c15_i32_24 : i32 to vector<1x256xi32>
    %61 = arith.cmpi slt, %0, %60 : vector<1x256xi32>
    %c1_i32_25 = arith.constant 1 : i32
    %62 = vector.broadcast %c1_i32_25 : i32 to vector<1x256xi32>
    %63 = arith.cmpi sge, %1, %62 : vector<1x256xi32>
    %64 = arith.andi %61, %63 : vector<1x256xi1>
    %65 = arith.extui %64 : vector<1x256xi1> to vector<1x256xi32>
    %66 = arith.sitofp %65 : vector<1x256xi32> to vector<1x256xf32>
    %67 = vector.broadcast %66 : vector<1x256xf32> to vector<8x256xf32>
    %68 = arith.mulf %59, %67 : vector<8x256xf32>
    %c240_i32 = arith.constant 240 : i32
    %69 = tpu.dynamic_rotate %17 by %c240_i32 dim 1 : vector<8x256xf32>, i32 -> vector<8x256xf32>
    %c15_i32_26 = arith.constant 15 : i32
    %70 = vector.broadcast %c15_i32_26 : i32 to vector<1x256xi32>
    %71 = arith.cmpi slt, %0, %70 : vector<1x256xi32>
    %72 = arith.extui %71 : vector<1x256xi1> to vector<1x256xi32>
    %73 = arith.sitofp %72 : vector<1x256xi32> to vector<1x256xf32>
    %74 = vector.broadcast %73 : vector<1x256xf32> to vector<8x256xf32>
    %75 = arith.mulf %69, %74 : vector<8x256xf32>
    %c239_i32 = arith.constant 239 : i32
    %76 = tpu.dynamic_rotate %17 by %c239_i32 dim 1 : vector<8x256xf32>, i32 -> vector<8x256xf32>
    %c15_i32_27 = arith.constant 15 : i32
    %77 = vector.broadcast %c15_i32_27 : i32 to vector<1x256xi32>
    %78 = arith.cmpi slt, %0, %77 : vector<1x256xi32>
    %c15_i32_28 = arith.constant 15 : i32
    %79 = vector.broadcast %c15_i32_28 : i32 to vector<1x256xi32>
    %80 = arith.cmpi slt, %1, %79 : vector<1x256xi32>
    %81 = arith.andi %78, %80 : vector<1x256xi1>
    %82 = arith.extui %81 : vector<1x256xi1> to vector<1x256xi32>
    %83 = arith.sitofp %82 : vector<1x256xi32> to vector<1x256xf32>
    %84 = vector.broadcast %83 : vector<1x256xf32> to vector<8x256xf32>
    %85 = arith.mulf %76, %84 : vector<8x256xf32>
    %86 = tpu.concatenate %27, %34, %44, %51, %17, %58, %68, %75, %85 in 0 : vector<8x256xf32>, vector<8x256xf32>, vector<8x256xf32>, vector<8x256xf32>, vector<8x256xf32>, vector<8x256xf32>, vector<8x256xf32>, vector<8x256xf32>, vector<8x256xf32> -> vector<72x256xf32>
    %c0_29 = arith.constant 0 : index
    %c0_30 = arith.constant 0 : index
    %87 = vector.load %arg19[%c0_29, %c0_30] : memref<8x72xf32, #tpu.memory_space<vmem>>, vector<8x72xf32>
    %cst_31 = arith.constant dense<0.000000e+00> : vector<8x256xf32>
    %88 = tpu.matmul %87, %86, %cst_31 {dimension_numbers = #tpu.dot_dimension_numbers<[1], [0], [0], [1], [0, 0, 1, 1], [], []>} : vector<8x72xf32>, vector<72x256xf32>, vector<8x256xf32> -> vector<8x256xf32>
    %c0_32 = arith.constant 0 : index
    %c0_33 = arith.constant 0 : index
    %89 = vector.load %arg20[%c0_32, %c0_33] : memref<8x1xf32, #tpu.memory_space<vmem>>, vector<8x1xf32>
    %90 = vector.broadcast %89 : vector<8x1xf32> to vector<8x256xf32>
    %91 = arith.addf %88, %90 : vector<8x256xf32>
    %cst_34 = arith.constant 0.000000e+00 : f32
    %92 = vector.broadcast %cst_34 : f32 to vector<8x256xf32>
    %93 = arith.maximumf %91, %92 : vector<8x256xf32>
    %c0_35 = arith.constant 0 : index
    %c0_36 = arith.constant 0 : index
    %94 = vector.load %arg21[%c0_35, %c0_36] : memref<2x8xf32, #tpu.memory_space<vmem>>, vector<2x8xf32>
    %cst_37 = arith.constant dense<0.000000e+00> : vector<2x256xf32>
    %95 = tpu.matmul %94, %93, %cst_37 {dimension_numbers = #tpu.dot_dimension_numbers<[1], [0], [0], [1], [0, 0, 1, 1], [], []>} : vector<2x8xf32>, vector<8x256xf32>, vector<2x256xf32> -> vector<2x256xf32>
    %c0_38 = arith.constant 0 : index
    %c0_39 = arith.constant 0 : index
    %96 = vector.load %arg22[%c0_38, %c0_39] : memref<2x1xf32, #tpu.memory_space<vmem>>, vector<2x1xf32>
    %97 = vector.broadcast %96 : vector<2x1xf32> to vector<2x256xf32>
    %98 = arith.addf %95, %97 : vector<2x256xf32>
    %cst_40 = arith.constant 0.000000e+00 : f32
    %99 = vector.broadcast %cst_40 : f32 to vector<2x256xf32>
    %100 = arith.maximumf %98, %99 : vector<2x256xf32>
    %c0_41 = arith.constant 0 : index
    %c0_42 = arith.constant 0 : index
    %101 = vector.load %arg23[%c0_41, %c0_42] : memref<8x8xf32, #tpu.memory_space<vmem>>, vector<8x8xf32>
    %cst_43 = arith.constant dense<0.000000e+00> : vector<8x256xf32>
    %102 = tpu.matmul %101, %3, %cst_43 {dimension_numbers = #tpu.dot_dimension_numbers<[1], [0], [0], [1], [0, 0, 1, 1], [], []>} : vector<8x8xf32>, vector<8x256xf32>, vector<8x256xf32> -> vector<8x256xf32>
    %c0_44 = arith.constant 0 : index
    %c0_45 = arith.constant 0 : index
    %103 = vector.load %arg24[%c0_44, %c0_45] : memref<8x1xf32, #tpu.memory_space<vmem>>, vector<8x1xf32>
    %104 = vector.broadcast %103 : vector<8x1xf32> to vector<8x256xf32>
    %105 = arith.addf %102, %104 : vector<8x256xf32>
    %cst_46 = arith.constant 0.000000e+00 : f32
    %106 = vector.broadcast %cst_46 : f32 to vector<8x256xf32>
    %107 = arith.maximumf %105, %106 : vector<8x256xf32>
    %c34_i32 = arith.constant 34 : i32
    %108 = tpu.dynamic_rotate %107 by %c34_i32 dim 1 : vector<8x256xf32>, i32 -> vector<8x256xf32>
    %c2_i32 = arith.constant 2 : i32
    %109 = vector.broadcast %c2_i32 : i32 to vector<1x256xi32>
    %110 = arith.cmpi sge, %0, %109 : vector<1x256xi32>
    %c2_i32_47 = arith.constant 2 : i32
    %111 = vector.broadcast %c2_i32_47 : i32 to vector<1x256xi32>
    %112 = arith.cmpi sge, %1, %111 : vector<1x256xi32>
    %113 = arith.andi %110, %112 : vector<1x256xi1>
    %114 = arith.extui %113 : vector<1x256xi1> to vector<1x256xi32>
    %115 = arith.sitofp %114 : vector<1x256xi32> to vector<1x256xf32>
    %116 = vector.broadcast %115 : vector<1x256xf32> to vector<8x256xf32>
    %117 = arith.mulf %108, %116 : vector<8x256xf32>
    %c32_i32 = arith.constant 32 : i32
    %118 = tpu.dynamic_rotate %107 by %c32_i32 dim 1 : vector<8x256xf32>, i32 -> vector<8x256xf32>
    %c2_i32_48 = arith.constant 2 : i32
    %119 = vector.broadcast %c2_i32_48 : i32 to vector<1x256xi32>
    %120 = arith.cmpi sge, %0, %119 : vector<1x256xi32>
    %121 = arith.extui %120 : vector<1x256xi1> to vector<1x256xi32>
    %122 = arith.sitofp %121 : vector<1x256xi32> to vector<1x256xf32>
    %123 = vector.broadcast %122 : vector<1x256xf32> to vector<8x256xf32>
    %124 = arith.mulf %118, %123 : vector<8x256xf32>
    %c30_i32 = arith.constant 30 : i32
    %125 = tpu.dynamic_rotate %107 by %c30_i32 dim 1 : vector<8x256xf32>, i32 -> vector<8x256xf32>
    %c2_i32_49 = arith.constant 2 : i32
    %126 = vector.broadcast %c2_i32_49 : i32 to vector<1x256xi32>
    %127 = arith.cmpi sge, %0, %126 : vector<1x256xi32>
    %c14_i32 = arith.constant 14 : i32
    %128 = vector.broadcast %c14_i32 : i32 to vector<1x256xi32>
    %129 = arith.cmpi slt, %1, %128 : vector<1x256xi32>
    %130 = arith.andi %127, %129 : vector<1x256xi1>
    %131 = arith.extui %130 : vector<1x256xi1> to vector<1x256xi32>
    %132 = arith.sitofp %131 : vector<1x256xi32> to vector<1x256xf32>
    %133 = vector.broadcast %132 : vector<1x256xf32> to vector<8x256xf32>
    %134 = arith.mulf %125, %133 : vector<8x256xf32>
    %c2_i32_50 = arith.constant 2 : i32
    %135 = tpu.dynamic_rotate %107 by %c2_i32_50 dim 1 : vector<8x256xf32>, i32 -> vector<8x256xf32>
    %c2_i32_51 = arith.constant 2 : i32
    %136 = vector.broadcast %c2_i32_51 : i32 to vector<1x256xi32>
    %137 = arith.cmpi sge, %1, %136 : vector<1x256xi32>
    %138 = arith.extui %137 : vector<1x256xi1> to vector<1x256xi32>
    %139 = arith.sitofp %138 : vector<1x256xi32> to vector<1x256xf32>
    %140 = vector.broadcast %139 : vector<1x256xf32> to vector<8x256xf32>
    %141 = arith.mulf %135, %140 : vector<8x256xf32>
    %c254_i32 = arith.constant 254 : i32
    %142 = tpu.dynamic_rotate %107 by %c254_i32 dim 1 : vector<8x256xf32>, i32 -> vector<8x256xf32>
    %c14_i32_52 = arith.constant 14 : i32
    %143 = vector.broadcast %c14_i32_52 : i32 to vector<1x256xi32>
    %144 = arith.cmpi slt, %1, %143 : vector<1x256xi32>
    %145 = arith.extui %144 : vector<1x256xi1> to vector<1x256xi32>
    %146 = arith.sitofp %145 : vector<1x256xi32> to vector<1x256xf32>
    %147 = vector.broadcast %146 : vector<1x256xf32> to vector<8x256xf32>
    %148 = arith.mulf %142, %147 : vector<8x256xf32>
    %c226_i32 = arith.constant 226 : i32
    %149 = tpu.dynamic_rotate %107 by %c226_i32 dim 1 : vector<8x256xf32>, i32 -> vector<8x256xf32>
    %c14_i32_53 = arith.constant 14 : i32
    %150 = vector.broadcast %c14_i32_53 : i32 to vector<1x256xi32>
    %151 = arith.cmpi slt, %0, %150 : vector<1x256xi32>
    %c2_i32_54 = arith.constant 2 : i32
    %152 = vector.broadcast %c2_i32_54 : i32 to vector<1x256xi32>
    %153 = arith.cmpi sge, %1, %152 : vector<1x256xi32>
    %154 = arith.andi %151, %153 : vector<1x256xi1>
    %155 = arith.extui %154 : vector<1x256xi1> to vector<1x256xi32>
    %156 = arith.sitofp %155 : vector<1x256xi32> to vector<1x256xf32>
    %157 = vector.broadcast %156 : vector<1x256xf32> to vector<8x256xf32>
    %158 = arith.mulf %149, %157 : vector<8x256xf32>
    %c224_i32 = arith.constant 224 : i32
    %159 = tpu.dynamic_rotate %107 by %c224_i32 dim 1 : vector<8x256xf32>, i32 -> vector<8x256xf32>
    %c14_i32_55 = arith.constant 14 : i32
    %160 = vector.broadcast %c14_i32_55 : i32 to vector<1x256xi32>
    %161 = arith.cmpi slt, %0, %160 : vector<1x256xi32>
    %162 = arith.extui %161 : vector<1x256xi1> to vector<1x256xi32>
    %163 = arith.sitofp %162 : vector<1x256xi32> to vector<1x256xf32>
    %164 = vector.broadcast %163 : vector<1x256xf32> to vector<8x256xf32>
    %165 = arith.mulf %159, %164 : vector<8x256xf32>
    %c222_i32 = arith.constant 222 : i32
    %166 = tpu.dynamic_rotate %107 by %c222_i32 dim 1 : vector<8x256xf32>, i32 -> vector<8x256xf32>
    %c14_i32_56 = arith.constant 14 : i32
    %167 = vector.broadcast %c14_i32_56 : i32 to vector<1x256xi32>
    %168 = arith.cmpi slt, %0, %167 : vector<1x256xi32>
    %c14_i32_57 = arith.constant 14 : i32
    %169 = vector.broadcast %c14_i32_57 : i32 to vector<1x256xi32>
    %170 = arith.cmpi slt, %1, %169 : vector<1x256xi32>
    %171 = arith.andi %168, %170 : vector<1x256xi1>
    %172 = arith.extui %171 : vector<1x256xi1> to vector<1x256xi32>
    %173 = arith.sitofp %172 : vector<1x256xi32> to vector<1x256xf32>
    %174 = vector.broadcast %173 : vector<1x256xf32> to vector<8x256xf32>
    %175 = arith.mulf %166, %174 : vector<8x256xf32>
    %176 = tpu.concatenate %117, %124, %134, %141, %107, %148, %158, %165, %175 in 0 : vector<8x256xf32>, vector<8x256xf32>, vector<8x256xf32>, vector<8x256xf32>, vector<8x256xf32>, vector<8x256xf32>, vector<8x256xf32>, vector<8x256xf32>, vector<8x256xf32> -> vector<72x256xf32>
    %c0_58 = arith.constant 0 : index
    %c0_59 = arith.constant 0 : index
    %177 = vector.load %arg25[%c0_58, %c0_59] : memref<8x72xf32, #tpu.memory_space<vmem>>, vector<8x72xf32>
    %cst_60 = arith.constant dense<0.000000e+00> : vector<8x256xf32>
    %178 = tpu.matmul %177, %176, %cst_60 {dimension_numbers = #tpu.dot_dimension_numbers<[1], [0], [0], [1], [0, 0, 1, 1], [], []>} : vector<8x72xf32>, vector<72x256xf32>, vector<8x256xf32> -> vector<8x256xf32>
    %c0_61 = arith.constant 0 : index
    %c0_62 = arith.constant 0 : index
    %179 = vector.load %arg26[%c0_61, %c0_62] : memref<8x1xf32, #tpu.memory_space<vmem>>, vector<8x1xf32>
    %180 = vector.broadcast %179 : vector<8x1xf32> to vector<8x256xf32>
    %181 = arith.addf %178, %180 : vector<8x256xf32>
    %cst_63 = arith.constant 0.000000e+00 : f32
    %182 = vector.broadcast %cst_63 : f32 to vector<8x256xf32>
    %183 = arith.maximumf %181, %182 : vector<8x256xf32>
    %c0_64 = arith.constant 0 : index
    %c0_65 = arith.constant 0 : index
    %184 = vector.load %arg27[%c0_64, %c0_65] : memref<2x8xf32, #tpu.memory_space<vmem>>, vector<2x8xf32>
    %cst_66 = arith.constant dense<0.000000e+00> : vector<2x256xf32>
    %185 = tpu.matmul %184, %183, %cst_66 {dimension_numbers = #tpu.dot_dimension_numbers<[1], [0], [0], [1], [0, 0, 1, 1], [], []>} : vector<2x8xf32>, vector<8x256xf32>, vector<2x256xf32> -> vector<2x256xf32>
    %c0_67 = arith.constant 0 : index
    %c0_68 = arith.constant 0 : index
    %186 = vector.load %arg28[%c0_67, %c0_68] : memref<2x1xf32, #tpu.memory_space<vmem>>, vector<2x1xf32>
    %187 = vector.broadcast %186 : vector<2x1xf32> to vector<2x256xf32>
    %188 = arith.addf %185, %187 : vector<2x256xf32>
    %cst_69 = arith.constant 0.000000e+00 : f32
    %189 = vector.broadcast %cst_69 : f32 to vector<2x256xf32>
    %190 = arith.maximumf %188, %189 : vector<2x256xf32>
    %c0_70 = arith.constant 0 : index
    %c0_71 = arith.constant 0 : index
    %191 = vector.load %arg29[%c0_70, %c0_71] : memref<8x8xf32, #tpu.memory_space<vmem>>, vector<8x8xf32>
    %cst_72 = arith.constant dense<0.000000e+00> : vector<8x256xf32>
    %192 = tpu.matmul %191, %3, %cst_72 {dimension_numbers = #tpu.dot_dimension_numbers<[1], [0], [0], [1], [0, 0, 1, 1], [], []>} : vector<8x8xf32>, vector<8x256xf32>, vector<8x256xf32> -> vector<8x256xf32>
    %c0_73 = arith.constant 0 : index
    %c0_74 = arith.constant 0 : index
    %193 = vector.load %arg30[%c0_73, %c0_74] : memref<8x1xf32, #tpu.memory_space<vmem>>, vector<8x1xf32>
    %194 = vector.broadcast %193 : vector<8x1xf32> to vector<8x256xf32>
    %195 = arith.addf %192, %194 : vector<8x256xf32>
    %cst_75 = arith.constant 0.000000e+00 : f32
    %196 = vector.broadcast %cst_75 : f32 to vector<8x256xf32>
    %197 = arith.maximumf %195, %196 : vector<8x256xf32>
    %c1_i32_76 = arith.constant 1 : i32
    %198 = tpu.dynamic_rotate %197 by %c1_i32_76 dim 1 : vector<8x256xf32>, i32 -> vector<8x256xf32>
    %199 = vector.broadcast %49 : vector<1x256xf32> to vector<8x256xf32>
    %200 = arith.mulf %198, %199 : vector<8x256xf32>
    %c255_i32_77 = arith.constant 255 : i32
    %201 = tpu.dynamic_rotate %197 by %c255_i32_77 dim 1 : vector<8x256xf32>, i32 -> vector<8x256xf32>
    %202 = vector.broadcast %56 : vector<1x256xf32> to vector<8x256xf32>
    %203 = arith.mulf %201, %202 : vector<8x256xf32>
    %204 = tpu.concatenate %200, %197, %203 in 0 : vector<8x256xf32>, vector<8x256xf32>, vector<8x256xf32> -> vector<24x256xf32>
    %c0_78 = arith.constant 0 : index
    %c0_79 = arith.constant 0 : index
    %205 = vector.load %arg31[%c0_78, %c0_79] : memref<8x24xf32, #tpu.memory_space<vmem>>, vector<8x24xf32>
    %cst_80 = arith.constant dense<0.000000e+00> : vector<8x256xf32>
    %206 = tpu.matmul %205, %204, %cst_80 {dimension_numbers = #tpu.dot_dimension_numbers<[1], [0], [0], [1], [0, 0, 1, 1], [], []>} : vector<8x24xf32>, vector<24x256xf32>, vector<8x256xf32> -> vector<8x256xf32>
    %c0_81 = arith.constant 0 : index
    %c0_82 = arith.constant 0 : index
    %207 = vector.load %arg32[%c0_81, %c0_82] : memref<8x1xf32, #tpu.memory_space<vmem>>, vector<8x1xf32>
    %208 = vector.broadcast %207 : vector<8x1xf32> to vector<8x256xf32>
    %209 = arith.addf %206, %208 : vector<8x256xf32>
    %cst_83 = arith.constant 0.000000e+00 : f32
    %210 = vector.broadcast %cst_83 : f32 to vector<8x256xf32>
    %211 = arith.maximumf %209, %210 : vector<8x256xf32>
    %c16_i32_84 = arith.constant 16 : i32
    %212 = tpu.dynamic_rotate %211 by %c16_i32_84 dim 1 : vector<8x256xf32>, i32 -> vector<8x256xf32>
    %213 = vector.broadcast %32 : vector<1x256xf32> to vector<8x256xf32>
    %214 = arith.mulf %212, %213 : vector<8x256xf32>
    %c240_i32_85 = arith.constant 240 : i32
    %215 = tpu.dynamic_rotate %211 by %c240_i32_85 dim 1 : vector<8x256xf32>, i32 -> vector<8x256xf32>
    %216 = vector.broadcast %73 : vector<1x256xf32> to vector<8x256xf32>
    %217 = arith.mulf %215, %216 : vector<8x256xf32>
    %218 = tpu.concatenate %214, %211, %217 in 0 : vector<8x256xf32>, vector<8x256xf32>, vector<8x256xf32> -> vector<24x256xf32>
    %c0_86 = arith.constant 0 : index
    %c0_87 = arith.constant 0 : index
    %219 = vector.load %arg33[%c0_86, %c0_87] : memref<8x24xf32, #tpu.memory_space<vmem>>, vector<8x24xf32>
    %cst_88 = arith.constant dense<0.000000e+00> : vector<8x256xf32>
    %220 = tpu.matmul %219, %218, %cst_88 {dimension_numbers = #tpu.dot_dimension_numbers<[1], [0], [0], [1], [0, 0, 1, 1], [], []>} : vector<8x24xf32>, vector<24x256xf32>, vector<8x256xf32> -> vector<8x256xf32>
    %c0_89 = arith.constant 0 : index
    %c0_90 = arith.constant 0 : index
    %221 = vector.load %arg34[%c0_89, %c0_90] : memref<8x1xf32, #tpu.memory_space<vmem>>, vector<8x1xf32>
    %222 = vector.broadcast %221 : vector<8x1xf32> to vector<8x256xf32>
    %223 = arith.addf %220, %222 : vector<8x256xf32>
    %cst_91 = arith.constant 0.000000e+00 : f32
    %224 = vector.broadcast %cst_91 : f32 to vector<8x256xf32>
    %225 = arith.maximumf %223, %224 : vector<8x256xf32>
    %c0_92 = arith.constant 0 : index
    %c0_93 = arith.constant 0 : index
    %226 = vector.load %arg35[%c0_92, %c0_93] : memref<2x8xf32, #tpu.memory_space<vmem>>, vector<2x8xf32>
    %cst_94 = arith.constant dense<0.000000e+00> : vector<2x256xf32>
    %227 = tpu.matmul %226, %225, %cst_94 {dimension_numbers = #tpu.dot_dimension_numbers<[1], [0], [0], [1], [0, 0, 1, 1], [], []>} : vector<2x8xf32>, vector<8x256xf32>, vector<2x256xf32> -> vector<2x256xf32>
    %c0_95 = arith.constant 0 : index
    %c0_96 = arith.constant 0 : index
    %228 = vector.load %arg36[%c0_95, %c0_96] : memref<2x1xf32, #tpu.memory_space<vmem>>, vector<2x1xf32>
    %229 = vector.broadcast %228 : vector<2x1xf32> to vector<2x256xf32>
    %230 = arith.addf %227, %229 : vector<2x256xf32>
    %cst_97 = arith.constant 0.000000e+00 : f32
    %231 = vector.broadcast %cst_97 : f32 to vector<2x256xf32>
    %232 = arith.maximumf %230, %231 : vector<2x256xf32>
    %c0_98 = arith.constant 0 : index
    %c0_99 = arith.constant 0 : index
    %233 = vector.load %arg10[%c0_98, %c0_99] : memref<8x2xf32, #tpu.memory_space<vmem>>, vector<8x2xf32>
    %cst_100 = arith.constant dense<0.000000e+00> : vector<8x256xf32>
    %234 = tpu.matmul %233, %10, %cst_100 {dimension_numbers = #tpu.dot_dimension_numbers<[1], [0], [0], [1], [0, 0, 1, 1], [], []>} : vector<8x2xf32>, vector<2x256xf32>, vector<8x256xf32> -> vector<8x256xf32>
    %c0_101 = arith.constant 0 : index
    %c0_102 = arith.constant 0 : index
    %235 = vector.load %arg11[%c0_101, %c0_102] : memref<8x2xf32, #tpu.memory_space<vmem>>, vector<8x2xf32>
    %cst_103 = arith.constant dense<0.000000e+00> : vector<8x256xf32>
    %236 = tpu.matmul %235, %100, %cst_103 {dimension_numbers = #tpu.dot_dimension_numbers<[1], [0], [0], [1], [0, 0, 1, 1], [], []>} : vector<8x2xf32>, vector<2x256xf32>, vector<8x256xf32> -> vector<8x256xf32>
    %237 = arith.addf %234, %236 : vector<8x256xf32>
    %c0_104 = arith.constant 0 : index
    %c0_105 = arith.constant 0 : index
    %238 = vector.load %arg12[%c0_104, %c0_105] : memref<8x2xf32, #tpu.memory_space<vmem>>, vector<8x2xf32>
    %cst_106 = arith.constant dense<0.000000e+00> : vector<8x256xf32>
    %239 = tpu.matmul %238, %190, %cst_106 {dimension_numbers = #tpu.dot_dimension_numbers<[1], [0], [0], [1], [0, 0, 1, 1], [], []>} : vector<8x2xf32>, vector<2x256xf32>, vector<8x256xf32> -> vector<8x256xf32>
    %240 = arith.addf %237, %239 : vector<8x256xf32>
    %c0_107 = arith.constant 0 : index
    %c0_108 = arith.constant 0 : index
    %241 = vector.load %arg13[%c0_107, %c0_108] : memref<8x2xf32, #tpu.memory_space<vmem>>, vector<8x2xf32>
    %cst_109 = arith.constant dense<0.000000e+00> : vector<8x256xf32>
    %242 = tpu.matmul %241, %232, %cst_109 {dimension_numbers = #tpu.dot_dimension_numbers<[1], [0], [0], [1], [0, 0, 1, 1], [], []>} : vector<8x2xf32>, vector<2x256xf32>, vector<8x256xf32> -> vector<8x256xf32>
    %243 = arith.addf %240, %242 : vector<8x256xf32>
    %c0_110 = arith.constant 0 : index
    %c0_111 = arith.constant 0 : index
    %244 = vector.load %arg14[%c0_110, %c0_111] : memref<8x1xf32, #tpu.memory_space<vmem>>, vector<8x1xf32>
    %245 = vector.broadcast %244 : vector<8x1xf32> to vector<8x256xf32>
    %246 = arith.addf %243, %245 : vector<8x256xf32>
    %cst_112 = arith.constant dense<0.000000e+00> : vector<8xf32>
    %247 = vector.multi_reduction <add>, %246, %cst_112 [1] : vector<8x256xf32> to vector<8xf32>
    %248 = vector.shape_cast %247 : vector<8xf32> to vector<8x1xf32>
    %cst_113 = arith.constant 2.560000e+02 : f32
    %249 = vector.broadcast %cst_113 : f32 to vector<8x1xf32>
    %250 = arith.divf %248, %249 : vector<8x1xf32>
    %cst_114 = arith.constant dense<0xFF800000> : vector<8xf32>
    %251 = vector.multi_reduction <maximumf>, %246, %cst_114 [1] : vector<8x256xf32> to vector<8xf32>
    %252 = vector.shape_cast %251 : vector<8xf32> to vector<8x1xf32>
    %c0_115 = arith.constant 0 : index
    %c0_116 = arith.constant 0 : index
    %253 = vector.load %arg4[%c0_115, %c0_116] : memref<2x8xf32, #tpu.memory_space<vmem>>, vector<2x8xf32>
    %cst_117 = arith.constant dense<0.000000e+00> : vector<2x1xf32>
    %254 = tpu.matmul %253, %250, %cst_117 {dimension_numbers = #tpu.dot_dimension_numbers<[1], [0], [0], [1], [0, 0, 1, 1], [], []>} : vector<2x8xf32>, vector<8x1xf32>, vector<2x1xf32> -> vector<2x1xf32>
    %c0_118 = arith.constant 0 : index
    %c0_119 = arith.constant 0 : index
    %255 = vector.load %arg5[%c0_118, %c0_119] : memref<2x1xf32, #tpu.memory_space<vmem>>, vector<2x1xf32>
    %256 = arith.addf %254, %255 : vector<2x1xf32>
    %cst_120 = arith.constant 0.000000e+00 : f32
    %257 = vector.broadcast %cst_120 : f32 to vector<2x1xf32>
    %258 = arith.maximumf %256, %257 : vector<2x1xf32>
    %c0_121 = arith.constant 0 : index
    %c0_122 = arith.constant 0 : index
    %259 = vector.load %arg6[%c0_121, %c0_122] : memref<8x2xf32, #tpu.memory_space<vmem>>, vector<8x2xf32>
    %cst_123 = arith.constant dense<0.000000e+00> : vector<8x1xf32>
    %260 = tpu.matmul %259, %258, %cst_123 {dimension_numbers = #tpu.dot_dimension_numbers<[1], [0], [0], [1], [0, 0, 1, 1], [], []>} : vector<8x2xf32>, vector<2x1xf32>, vector<8x1xf32> -> vector<8x1xf32>
    %c0_124 = arith.constant 0 : index
    %c0_125 = arith.constant 0 : index
    %261 = vector.load %arg7[%c0_124, %c0_125] : memref<8x1xf32, #tpu.memory_space<vmem>>, vector<8x1xf32>
    %262 = arith.addf %260, %261 : vector<8x1xf32>
    %c0_126 = arith.constant 0 : index
    %c0_127 = arith.constant 0 : index
    %263 = vector.load %arg4[%c0_126, %c0_127] : memref<2x8xf32, #tpu.memory_space<vmem>>, vector<2x8xf32>
    %cst_128 = arith.constant dense<0.000000e+00> : vector<2x1xf32>
    %264 = tpu.matmul %263, %252, %cst_128 {dimension_numbers = #tpu.dot_dimension_numbers<[1], [0], [0], [1], [0, 0, 1, 1], [], []>} : vector<2x8xf32>, vector<8x1xf32>, vector<2x1xf32> -> vector<2x1xf32>
    %c0_129 = arith.constant 0 : index
    %c0_130 = arith.constant 0 : index
    %265 = vector.load %arg5[%c0_129, %c0_130] : memref<2x1xf32, #tpu.memory_space<vmem>>, vector<2x1xf32>
    %266 = arith.addf %264, %265 : vector<2x1xf32>
    %cst_131 = arith.constant 0.000000e+00 : f32
    %267 = vector.broadcast %cst_131 : f32 to vector<2x1xf32>
    %268 = arith.maximumf %266, %267 : vector<2x1xf32>
    %c0_132 = arith.constant 0 : index
    %c0_133 = arith.constant 0 : index
    %269 = vector.load %arg6[%c0_132, %c0_133] : memref<8x2xf32, #tpu.memory_space<vmem>>, vector<8x2xf32>
    %cst_134 = arith.constant dense<0.000000e+00> : vector<8x1xf32>
    %270 = tpu.matmul %269, %268, %cst_134 {dimension_numbers = #tpu.dot_dimension_numbers<[1], [0], [0], [1], [0, 0, 1, 1], [], []>} : vector<8x2xf32>, vector<2x1xf32>, vector<8x1xf32> -> vector<8x1xf32>
    %c0_135 = arith.constant 0 : index
    %c0_136 = arith.constant 0 : index
    %271 = vector.load %arg7[%c0_135, %c0_136] : memref<8x1xf32, #tpu.memory_space<vmem>>, vector<8x1xf32>
    %272 = arith.addf %270, %271 : vector<8x1xf32>
    %273 = arith.addf %262, %272 : vector<8x1xf32>
    %cst_137 = arith.constant 0.000000e+00 : f32
    %274 = vector.broadcast %cst_137 : f32 to vector<8x1xf32>
    %275 = arith.subf %274, %273 : vector<8x1xf32>
    %276 = math.exp %275 : vector<8x1xf32>
    %cst_138 = arith.constant 1.000000e+00 : f32
    %277 = vector.broadcast %cst_138 : f32 to vector<8x1xf32>
    %278 = arith.addf %277, %276 : vector<8x1xf32>
    %cst_139 = arith.constant 1.000000e+00 : f32
    %279 = vector.broadcast %cst_139 : f32 to vector<8x1xf32>
    %280 = arith.divf %279, %278 : vector<8x1xf32>
    %281 = vector.broadcast %280 : vector<8x1xf32> to vector<8x256xf32>
    %282 = arith.mulf %246, %281 : vector<8x256xf32>
    %cst_140 = arith.constant dense<0.000000e+00> : vector<256xf32>
    %283 = vector.multi_reduction <add>, %282, %cst_140 [0] : vector<8x256xf32> to vector<256xf32>
    %284 = vector.shape_cast %283 : vector<256xf32> to vector<1x256xf32>
    %cst_141 = arith.constant 8.000000e+00 : f32
    %285 = vector.broadcast %cst_141 : f32 to vector<1x256xf32>
    %286 = arith.divf %284, %285 : vector<1x256xf32>
    %cst_142 = arith.constant dense<0xFF800000> : vector<256xf32>
    %287 = vector.multi_reduction <maximumf>, %282, %cst_142 [0] : vector<8x256xf32> to vector<256xf32>
    %288 = vector.shape_cast %287 : vector<256xf32> to vector<1x256xf32>
    %289 = tpu.concatenate %286, %288 in 0 : vector<1x256xf32>, vector<1x256xf32> -> vector<2x256xf32>
    %c17_i32_143 = arith.constant 17 : i32
    %290 = tpu.dynamic_rotate %289 by %c17_i32_143 dim 1 : vector<2x256xf32>, i32 -> vector<2x256xf32>
    %291 = vector.broadcast %25 : vector<1x256xf32> to vector<2x256xf32>
    %292 = arith.mulf %290, %291 : vector<2x256xf32>
    %c16_i32_144 = arith.constant 16 : i32
    %293 = tpu.dynamic_rotate %289 by %c16_i32_144 dim 1 : vector<2x256xf32>, i32 -> vector<2x256xf32>
    %294 = vector.broadcast %32 : vector<1x256xf32> to vector<2x256xf32>
    %295 = arith.mulf %293, %294 : vector<2x256xf32>
    %c15_i32_145 = arith.constant 15 : i32
    %296 = tpu.dynamic_rotate %289 by %c15_i32_145 dim 1 : vector<2x256xf32>, i32 -> vector<2x256xf32>
    %297 = vector.broadcast %42 : vector<1x256xf32> to vector<2x256xf32>
    %298 = arith.mulf %296, %297 : vector<2x256xf32>
    %c1_i32_146 = arith.constant 1 : i32
    %299 = tpu.dynamic_rotate %289 by %c1_i32_146 dim 1 : vector<2x256xf32>, i32 -> vector<2x256xf32>
    %300 = vector.broadcast %49 : vector<1x256xf32> to vector<2x256xf32>
    %301 = arith.mulf %299, %300 : vector<2x256xf32>
    %c255_i32_147 = arith.constant 255 : i32
    %302 = tpu.dynamic_rotate %289 by %c255_i32_147 dim 1 : vector<2x256xf32>, i32 -> vector<2x256xf32>
    %303 = vector.broadcast %56 : vector<1x256xf32> to vector<2x256xf32>
    %304 = arith.mulf %302, %303 : vector<2x256xf32>
    %c241_i32_148 = arith.constant 241 : i32
    %305 = tpu.dynamic_rotate %289 by %c241_i32_148 dim 1 : vector<2x256xf32>, i32 -> vector<2x256xf32>
    %306 = vector.broadcast %66 : vector<1x256xf32> to vector<2x256xf32>
    %307 = arith.mulf %305, %306 : vector<2x256xf32>
    %c240_i32_149 = arith.constant 240 : i32
    %308 = tpu.dynamic_rotate %289 by %c240_i32_149 dim 1 : vector<2x256xf32>, i32 -> vector<2x256xf32>
    %309 = vector.broadcast %73 : vector<1x256xf32> to vector<2x256xf32>
    %310 = arith.mulf %308, %309 : vector<2x256xf32>
    %c239_i32_150 = arith.constant 239 : i32
    %311 = tpu.dynamic_rotate %289 by %c239_i32_150 dim 1 : vector<2x256xf32>, i32 -> vector<2x256xf32>
    %312 = vector.broadcast %83 : vector<1x256xf32> to vector<2x256xf32>
    %313 = arith.mulf %311, %312 : vector<2x256xf32>
    %314 = tpu.concatenate %292, %295, %298, %301, %289, %304, %307, %310, %313 in 0 : vector<2x256xf32>, vector<2x256xf32>, vector<2x256xf32>, vector<2x256xf32>, vector<2x256xf32>, vector<2x256xf32>, vector<2x256xf32>, vector<2x256xf32>, vector<2x256xf32> -> vector<18x256xf32>
    %c0_151 = arith.constant 0 : index
    %c0_152 = arith.constant 0 : index
    %315 = vector.load %arg8[%c0_151, %c0_152] : memref<1x18xf32, #tpu.memory_space<vmem>>, vector<1x18xf32>
    %cst_153 = arith.constant dense<0.000000e+00> : vector<1x256xf32>
    %316 = tpu.matmul %315, %314, %cst_153 {dimension_numbers = #tpu.dot_dimension_numbers<[1], [0], [0], [1], [0, 0, 1, 1], [], []>} : vector<1x18xf32>, vector<18x256xf32>, vector<1x256xf32> -> vector<1x256xf32>
    %c0_154 = arith.constant 0 : index
    %c0_155 = arith.constant 0 : index
    %317 = vector.load %arg9[%c0_154, %c0_155] : memref<1x1xf32, #tpu.memory_space<vmem>>, vector<1x1xf32>
    %318 = vector.broadcast %317 : vector<1x1xf32> to vector<1x256xf32>
    %319 = arith.addf %316, %318 : vector<1x256xf32>
    %cst_156 = arith.constant 0.000000e+00 : f32
    %320 = vector.broadcast %cst_156 : f32 to vector<1x256xf32>
    %321 = arith.subf %320, %319 : vector<1x256xf32>
    %322 = math.exp %321 : vector<1x256xf32>
    %cst_157 = arith.constant 1.000000e+00 : f32
    %323 = vector.broadcast %cst_157 : f32 to vector<1x256xf32>
    %324 = arith.addf %323, %322 : vector<1x256xf32>
    %cst_158 = arith.constant 1.000000e+00 : f32
    %325 = vector.broadcast %cst_158 : f32 to vector<1x256xf32>
    %326 = arith.divf %325, %324 : vector<1x256xf32>
    %327 = vector.broadcast %326 : vector<1x256xf32> to vector<8x256xf32>
    %328 = arith.mulf %282, %327 : vector<8x256xf32>
    %329 = arith.addf %3, %328 : vector<8x256xf32>
    %cst_159 = arith.constant 0.000000e+00 : f32
    %330 = vector.broadcast %cst_159 : f32 to vector<8x256xf32>
    %331 = arith.maximumf %329, %330 : vector<8x256xf32>
    %c0_160 = arith.constant 0 : index
    %c0_161 = arith.constant 0 : index
    %c0_162 = arith.constant 0 : index
    %332 = vector.load %arg37[%c0_160, %c0_161, %c0_162] : memref<1x8x256xf32, #tpu.memory_space<vmem>>, vector<1x8x256xf32>
    %333 = vector.shape_cast %332 : vector<1x8x256xf32> to vector<8x256xf32>
    %334 = vector.shape_cast %331 : vector<8x256xf32> to vector<1x8x256xf32>
    tpu.vector_store %arg37[%c0_160, %c0_161, %c0_162], %334 {strides = array<i32>} : memref<1x8x256xf32, #tpu.memory_space<vmem>>, vector<1x8x256xf32>,
    return
  }
  func.func @transform_0(%arg0: i32) -> (i32, i32, i32) {
    %c0_i32 = arith.constant 0 : i32
    %c0_i32_0 = arith.constant 0 : i32
    %c0_i32_1 = arith.constant 0 : i32
    return %arg0, %c0_i32, %c0_i32_0 : i32, i32, i32
  }
  func.func @transform_1(%arg0: i32) -> (i32, i32) {
    %c0_i32 = arith.constant 0 : i32
    %c0_i32_0 = arith.constant 0 : i32
    %c0_i32_1 = arith.constant 0 : i32
    return %c0_i32, %c0_i32_0 : i32, i32
  }
  func.func @transform_2(%arg0: i32) -> (i32, i32) {
    %c0_i32 = arith.constant 0 : i32
    %c0_i32_0 = arith.constant 0 : i32
    %c0_i32_1 = arith.constant 0 : i32
    return %c0_i32, %c0_i32_0 : i32, i32
  }
  func.func @transform_3(%arg0: i32) -> (i32, i32) {
    %c0_i32 = arith.constant 0 : i32
    %c0_i32_0 = arith.constant 0 : i32
    %c0_i32_1 = arith.constant 0 : i32
    return %c0_i32, %c0_i32_0 : i32, i32
  }
  func.func @transform_4(%arg0: i32) -> (i32, i32) {
    %c0_i32 = arith.constant 0 : i32
    %c0_i32_0 = arith.constant 0 : i32
    %c0_i32_1 = arith.constant 0 : i32
    return %c0_i32, %c0_i32_0 : i32, i32
  }
  func.func @transform_5(%arg0: i32) -> (i32, i32) {
    %c0_i32 = arith.constant 0 : i32
    %c0_i32_0 = arith.constant 0 : i32
    %c0_i32_1 = arith.constant 0 : i32
    return %c0_i32, %c0_i32_0 : i32, i32
  }
  func.func @transform_6(%arg0: i32) -> (i32, i32) {
    %c0_i32 = arith.constant 0 : i32
    %c0_i32_0 = arith.constant 0 : i32
    %c0_i32_1 = arith.constant 0 : i32
    return %c0_i32, %c0_i32_0 : i32, i32
  }
  func.func @transform_7(%arg0: i32) -> (i32, i32) {
    %c0_i32 = arith.constant 0 : i32
    %c0_i32_0 = arith.constant 0 : i32
    %c0_i32_1 = arith.constant 0 : i32
    return %c0_i32, %c0_i32_0 : i32, i32
  }
  func.func @transform_8(%arg0: i32) -> (i32, i32) {
    %c0_i32 = arith.constant 0 : i32
    %c0_i32_0 = arith.constant 0 : i32
    %c0_i32_1 = arith.constant 0 : i32
    return %c0_i32, %c0_i32_0 : i32, i32
  }
  func.func @transform_9(%arg0: i32) -> (i32, i32) {
    %c0_i32 = arith.constant 0 : i32
    %c0_i32_0 = arith.constant 0 : i32
    %c0_i32_1 = arith.constant 0 : i32
    return %c0_i32, %c0_i32_0 : i32, i32
  }
  func.func @transform_10(%arg0: i32) -> (i32, i32) {
    %c0_i32 = arith.constant 0 : i32
    %c0_i32_0 = arith.constant 0 : i32
    %c0_i32_1 = arith.constant 0 : i32
    return %c0_i32, %c0_i32_0 : i32, i32
  }
  func.func @transform_11(%arg0: i32) -> (i32, i32) {
    %c0_i32 = arith.constant 0 : i32
    %c0_i32_0 = arith.constant 0 : i32
    %c0_i32_1 = arith.constant 0 : i32
    return %c0_i32, %c0_i32_0 : i32, i32
  }
  func.func @transform_12(%arg0: i32) -> (i32, i32) {
    %c0_i32 = arith.constant 0 : i32
    %c0_i32_0 = arith.constant 0 : i32
    %c0_i32_1 = arith.constant 0 : i32
    return %c0_i32, %c0_i32_0 : i32, i32
  }
  func.func @transform_13(%arg0: i32) -> (i32, i32) {
    %c0_i32 = arith.constant 0 : i32
    %c0_i32_0 = arith.constant 0 : i32
    %c0_i32_1 = arith.constant 0 : i32
    return %c0_i32, %c0_i32_0 : i32, i32
  }
  func.func @transform_14(%arg0: i32) -> (i32, i32) {
    %c0_i32 = arith.constant 0 : i32
    %c0_i32_0 = arith.constant 0 : i32
    %c0_i32_1 = arith.constant 0 : i32
    return %c0_i32, %c0_i32_0 : i32, i32
  }
  func.func @transform_15(%arg0: i32) -> (i32, i32) {
    %c0_i32 = arith.constant 0 : i32
    %c0_i32_0 = arith.constant 0 : i32
    %c0_i32_1 = arith.constant 0 : i32
    return %c0_i32, %c0_i32_0 : i32, i32
  }
  func.func @transform_16(%arg0: i32) -> (i32, i32) {
    %c0_i32 = arith.constant 0 : i32
    %c0_i32_0 = arith.constant 0 : i32
    %c0_i32_1 = arith.constant 0 : i32
    return %c0_i32, %c0_i32_0 : i32, i32
  }
  func.func @transform_17(%arg0: i32) -> (i32, i32) {
    %c0_i32 = arith.constant 0 : i32
    %c0_i32_0 = arith.constant 0 : i32
    %c0_i32_1 = arith.constant 0 : i32
    return %c0_i32, %c0_i32_0 : i32, i32
  }
  func.func @transform_18(%arg0: i32) -> (i32, i32) {
    %c0_i32 = arith.constant 0 : i32
    %c0_i32_0 = arith.constant 0 : i32
    %c0_i32_1 = arith.constant 0 : i32
    return %c0_i32, %c0_i32_0 : i32, i32
  }
  func.func @transform_19(%arg0: i32) -> (i32, i32) {
    %c0_i32 = arith.constant 0 : i32
    %c0_i32_0 = arith.constant 0 : i32
    %c0_i32_1 = arith.constant 0 : i32
    return %c0_i32, %c0_i32_0 : i32, i32
  }
  func.func @transform_20(%arg0: i32) -> (i32, i32) {
    %c0_i32 = arith.constant 0 : i32
    %c0_i32_0 = arith.constant 0 : i32
    %c0_i32_1 = arith.constant 0 : i32
    return %c0_i32, %c0_i32_0 : i32, i32
  }
  func.func @transform_21(%arg0: i32) -> (i32, i32) {
    %c0_i32 = arith.constant 0 : i32
    %c0_i32_0 = arith.constant 0 : i32
    %c0_i32_1 = arith.constant 0 : i32
    return %c0_i32, %c0_i32_0 : i32, i32
  }
  func.func @transform_22(%arg0: i32) -> (i32, i32) {
    %c0_i32 = arith.constant 0 : i32
    %c0_i32_0 = arith.constant 0 : i32
    %c0_i32_1 = arith.constant 0 : i32
    return %c0_i32, %c0_i32_0 : i32, i32
  }
  func.func @transform_23(%arg0: i32) -> (i32, i32) {
    %c0_i32 = arith.constant 0 : i32
    %c0_i32_0 = arith.constant 0 : i32
    %c0_i32_1 = arith.constant 0 : i32
    return %c0_i32, %c0_i32_0 : i32, i32
  }
  func.func @transform_24(%arg0: i32) -> (i32, i32) {
    %c0_i32 = arith.constant 0 : i32
    %c0_i32_0 = arith.constant 0 : i32
    %c0_i32_1 = arith.constant 0 : i32
    return %c0_i32, %c0_i32_0 : i32, i32
  }
  func.func @transform_25(%arg0: i32) -> (i32, i32) {
    %c0_i32 = arith.constant 0 : i32
    %c0_i32_0 = arith.constant 0 : i32
    %c0_i32_1 = arith.constant 0 : i32
    return %c0_i32, %c0_i32_0 : i32, i32
  }
  func.func @transform_26(%arg0: i32) -> (i32, i32) {
    %c0_i32 = arith.constant 0 : i32
    %c0_i32_0 = arith.constant 0 : i32
    %c0_i32_1 = arith.constant 0 : i32
    return %c0_i32, %c0_i32_0 : i32, i32
  }
  func.func @transform_27(%arg0: i32) -> (i32, i32) {
    %c0_i32 = arith.constant 0 : i32
    %c0_i32_0 = arith.constant 0 : i32
    %c0_i32_1 = arith.constant 0 : i32
    return %c0_i32, %c0_i32_0 : i32, i32
  }
  func.func @transform_28(%arg0: i32) -> (i32, i32) {
    %c0_i32 = arith.constant 0 : i32
    %c0_i32_0 = arith.constant 0 : i32
    %c0_i32_1 = arith.constant 0 : i32
    return %c0_i32, %c0_i32_0 : i32, i32
  }
  func.func @transform_29(%arg0: i32) -> (i32, i32) {
    %c0_i32 = arith.constant 0 : i32
    %c0_i32_0 = arith.constant 0 : i32
    %c0_i32_1 = arith.constant 0 : i32
    return %c0_i32, %c0_i32_0 : i32, i32
  }
  func.func @transform_30(%arg0: i32) -> (i32, i32) {
    %c0_i32 = arith.constant 0 : i32
    %c0_i32_0 = arith.constant 0 : i32
    %c0_i32_1 = arith.constant 0 : i32
    return %c0_i32, %c0_i32_0 : i32, i32
  }
  func.func @transform_31(%arg0: i32) -> (i32, i32) {
    %c0_i32 = arith.constant 0 : i32
    %c0_i32_0 = arith.constant 0 : i32
    %c0_i32_1 = arith.constant 0 : i32
    return %c0_i32, %c0_i32_0 : i32, i32
  }
  func.func @transform_32(%arg0: i32) -> (i32, i32) {
    %c0_i32 = arith.constant 0 : i32
    %c0_i32_0 = arith.constant 0 : i32
    %c0_i32_1 = arith.constant 0 : i32
    return %c0_i32, %c0_i32_0 : i32, i32
  }
  func.func @transform_33(%arg0: i32) -> (i32, i32) {
    %c0_i32 = arith.constant 0 : i32
    %c0_i32_0 = arith.constant 0 : i32
    %c0_i32_1 = arith.constant 0 : i32
    return %c0_i32, %c0_i32_0 : i32, i32
  }
  func.func @transform_34(%arg0: i32) -> (i32, i32) {
    %c0_i32 = arith.constant 0 : i32
    %c0_i32_0 = arith.constant 0 : i32
    %c0_i32_1 = arith.constant 0 : i32
    return %c0_i32, %c0_i32_0 : i32, i32
  }
  func.func @transform_35(%arg0: i32) -> (i32, i32) {
    %c0_i32 = arith.constant 0 : i32
    %c0_i32_0 = arith.constant 0 : i32
    %c0_i32_1 = arith.constant 0 : i32
    return %c0_i32, %c0_i32_0 : i32, i32
  }
  func.func @transform_36(%arg0: i32) -> (i32, i32, i32) {
    %c0_i32 = arith.constant 0 : i32
    %c0_i32_0 = arith.constant 0 : i32
    %c0_i32_1 = arith.constant 0 : i32
    return %arg0, %c0_i32, %c0_i32_0 : i32, i32, i32
  }
}

</mosaic_0001>

<bundles_post_ra>
// kernel: csp_cat_bottle_block_v2.1
= control target key start
LH: loop header
LB: loop body
LE: loop exit
PB: predicated region body
PF: predicated region fallthrough
CT: control target
= control target key end

     0   :  { %s3666_s6 = smov 1   ;;  %s3667_s10 = smov 2   ;;  %s4465_s0 = inlined_call_operand.smem [shape: u32[37], index: -1, kind: input, shape index: {}] }
   0x1   :  { %s3729_s5 = sld [smem:[%s4465_s0]]   ;;  %s3668_s14 = smov 3  }
   0x2   :  { %s3734_s9 = sld [smem:[%s4465_s0 + %s3666_s6]]   ;;  %s3669_s18 = smov 4  }
   0x3   :  { %s3739_s13 = sld [smem:[%s4465_s0 + %s3667_s10]]   ;;  %s3670_s22 = smov 5  }
   0x4   :  { %s3744_s17 = sld [smem:[%s4465_s0 + %s3668_s14]]   ;;  %s3671_s26 = smov 6  }
   0x5   :  { %s3749_s21 = sld [smem:[%s4465_s0 + %s3669_s18]]   ;;  %s3672_s30 = smov 7  }
   0x6   :  { %s3754_s25 = sld [smem:[%s4465_s0 + %s3670_s22]]   ;;  %s3673_s4 = smov 8  }
   0x7   :  { %s3759_s29 = sld [smem:[%s4465_s0 + %s3671_s26]]   ;;  %s3674_s10 = smov 9  }
   0x8   :  { %s3764_s3 = sld [smem:[%s4465_s0 + %s3672_s30]]   ;;  %s3675_s15 = smov 10  }
   0x9   :  { %s3407_s8 = sld [smem:[%s4465_s0 + %s3673_s4]]   ;;  %s3676_s20 = smov 11  }
   0xa   :  { %4473 = sst [smem:[#allocation3_spill]] %s3744_s17  ;;  %s3677_s26 = smov 12  }
   0xb   :  { %4474 = sst [smem:[#allocation4_spill]] %s3749_s21  ;;  %s3678_s1 = smov 13  }
   0xc   :  { %4475 = sst [smem:[#allocation5_spill]] %s3754_s25  ;;  %s3679_s7 = smov 14  }
   0xd   :  { %4476 = sst [smem:[#allocation6_spill]] %s3759_s29  ;;  %s3681_s22 = smov 16  }
   0xe   :  { %4477 = sst [smem:[#allocation7_spill]] %s3764_s3  ;;  %s3682_s28 = smov 17  }
   0xf   :  { %s3772_s14 = sld [smem:[%s4465_s0 + %s3674_s10]]   ;;  %v78_v0 = vstv %s3407_s8  ;;  %s3683_s8 = smov 18  }
  0x10   :  { %s3777_s19 = sld [smem:[%s4465_s0 + %s3675_s15]]   ;;  %s3680_s15 = smov 15   ;;  %79 = vst [vmem:[#allocation2] sm:$0x1] %v78_v0 }
  0x11   :  { %s3782_s24 = sld [smem:[%s4465_s0 + %s3676_s20]]  }
  0x12   :  { %s3787_s30 = sld [smem:[%s4465_s0 + %s3677_s26]]  }
  0x13   :  { %s3792_s6 = sld [smem:[%s4465_s0 + %s3678_s1]]  }
  0x14   :  { %s3797_s12 = sld [smem:[%s4465_s0 + %s3679_s7]]  }
  0x15   :  { %4478 = sst [smem:[#allocation8_spill]] %s3772_s14 }
  0x16   :  { %4479 = sst [smem:[#allocation9_spill]] %s3777_s19 }
  0x17   :  { %4480 = sst [smem:[#allocation10_spill]] %s3782_s24 }
  0x18   :  { %4481 = sst [smem:[#allocation11_spill]] %s3787_s30 }
  0x19   :  { %4482 = sst [smem:[#allocation12_spill]] %s3792_s6 }
  0x1a   :  { %s3802_s20 = sld [smem:[%s4465_s0 + %s3680_s15]]   ;;  %s3684_s15 = smov 19  }
  0x1b   :  { %s3807_s27 = sld [smem:[%s4465_s0 + %s3681_s22]]   ;;  %s3685_s22 = smov 20  }
  0x1c   :  { %s3812_s4 = sld [smem:[%s4465_s0 + %s3682_s28]]   ;;  %s3686_s28 = smov 21  }
  0x1d   :  { %s3817_s11 = sld [smem:[%s4465_s0 + %s3683_s8]]   ;;  %s3687_s8 = smov 22  }
  0x1e   :  { %s3822_s3 = sld [smem:[%s4465_s0 + %s3684_s15]]   ;;  %s3688_s15 = smov 23  }
  0x1f   :  { %s3827_s29 = sld [smem:[%s4465_s0 + %s3685_s22]]   ;;  %s3689_s22 = smov 24  }
  0x20   :  { %4483 = sst [smem:[#allocation13_spill]] %s3802_s20 }
  0x21   :  { %s3832_s25 = sld [smem:[%s4465_s0 + %s3686_s28]]   ;;  %s3690_s28 = smov 25  }
  0x22   :  { %s3837_s21 = sld [smem:[%s4465_s0 + %s3687_s8]]   ;;  %s3691_s8 = smov 26  }
  0x23   :  { %s3842_s17 = sld [smem:[%s4465_s0 + %s3688_s15]]   ;;  %s3692_s15 = smov 27  }
  0x24   :  { %s3847_s30 = sld [smem:[%s4465_s0 + %s3689_s22]]   ;;  %s3693_s22 = smov 28  }
  0x25   :  { %s3852_s24 = sld [smem:[%s4465_s0 + %s3690_s28]]   ;;  %s3694_s28 = smov 29  }
  0x26   :  { %s3857_s14 = sld [smem:[%s4465_s0 + %s3691_s8]]   ;;  %s3695_s8 = smov 30  }
  0x27   :  { %4484 = sst [smem:[#allocation14_spill]] %s3832_s25 }
  0x28   :  { %s3862_s19 = sld [smem:[%s4465_s0 + %s3692_s15]]   ;;  %s3696_s15 = smov 31  }
  0x29   :  { %s3867_s6 = sld [smem:[%s4465_s0 + %s3693_s22]]   ;;  %s3697_s22 = smov 32  }
  0x2a   :  { %s3872_s20 = sld [smem:[%s4465_s0 + %s3694_s28]]   ;;  %s3698_s28 = smov 33  }
  0x2b   :  { %s3877_s25 = sld [smem:[%s4465_s0 + %s3695_s8]]   ;;  %s3699_s8 = smov 34  }
  0x2c   :  { %4485 = sst [smem:[#allocation15_spill]] %s3857_s14 }
  0x2d   :  { %s3892_s14 = sld [smem:[%s4465_s0 + %s3698_s28]]   ;;  %s3909_s28 = smov 0  }
  0x2e   :  { %4486 = sst [smem:[#allocation16_spill]] %s3862_s19 }
  0x2f   :  { %4487 = sst [smem:[#allocation17_spill]] %s3867_s6 }
  0x30   :  { %s3882_s19 = sld [smem:[%s4465_s0 + %s3696_s15]]   ;;  %s3700_s15 = smov 35  }
  0x31   :  { %4488 = sst [smem:[#allocation18_spill]] %s3877_s25 }
  0x32   :  { %s3887_s6 = sld [smem:[%s4465_s0 + %s3697_s22]]   ;;  %s3701_s22 = smov 36  }
  0x33   :  { %s3897_s25 = sld [smem:[%s4465_s0 + %s3699_s8]]  }
  0x36   :  { %4489 = sst [smem:[#allocation19_spill]] %s3882_s19 }
  0x37   :  { %s3902_s19 = sld [smem:[%s4465_s0 + %s3700_s15]]  }
  0x38   :  { %4490 = sst [smem:[#allocation20_spill]] %s3887_s6 }
  0x39   :  { %s3907_s6 = sld [smem:[%s4465_s0 + %s3701_s22]]  }
  0x3a LB: > { %s3436_s1 = sadd.s32 4294967295, %s3664_s28   ;;  %p3440_p0 = scmp.ge.s32.totalorder %s3664_s28, 1  ;;  %s3664_s28 = sphi %s3909_s28, %s85_s28  }
  0x3b   : > { %p1001_p1 = scmp.lt.s32.totalorder %s3664_s28, 3 }
  0x3d   : > { %p1002_p2 = pnand %p3440_p0, %p1001_p1 }
  0x3e   : > { %p1091_p3 = scmp.lt.s32.totalorder (!%p1002_p2), %s3436_s1, 1  ;;  %v1190_v1 = vld [vmem:[%s3812_s4] sm:$0xff] (!%p1002_p2)  ;;  %v3702_v2 = vmov (!%p1002_p2), 0.0   ;;  %v3703_v3 = vmov (!%p1002_p2), 0   ;;  %vm1112_vm0 = vcmask (!%p1002_p2), 64512   ;;  %s3704_s8 = smov (!%p1002_p2), 16   ;;  %v1276_v17 = vlaneseq (!%p1002_p2) }
  0x3f   : > { %1005 = sbr.rel (%p1002_p2) target bundleno = 3971 (0xf83), region = 164  ;;  %1263 = vmatprep.mubr.f32.mxu1 (!%p1002_p2), %v3702_v2  ;;  %3642 = vset.pattern.permute.xlu0 (!%p1002_p2), %v3703_v3  ;;  %v1189_v6 = vld [vmem:[%s3807_s27] sm:$0xff] (!%p1002_p2)  ;;  %s4469_s7 = smov (!%p1002_p2), 17  }
  0x40   : > { %1193 = vperm.xlu0 (!%p1002_p2), %3642, %v1190_v1   ;;  %1180 = vmatprep.mubr.f32.mxu0 (!%p1002_p2), %v3702_v2  ;;  %v1105_v14 = vld [vmem:[%s3797_s12] sm:$0x3] (!%p1002_p2)  ;;  %s3706_s10 = smov (!%p1002_p2), 15   ;;  %s3707_s15 = smov (!%p1002_p2), 1   ;;  %v1288_v22 = vshrl.u32 (!%p1002_p2), %v1276_v17, 7  ;;  %v3989_v23 = vand.u32 (!%p1002_p2), 127, %v1276_v17 }
  0x41   : > { %3643 = vset.pattern.permute.xlu1 (!%p1002_p2), %v3703_v3  ;;  %s3708_s16 = smov (!%p1002_p2), 127   ;;  %s4471_s18 = smov (!%p1002_p2), 113   ;;  %v1626_v15 = vld [vmem:[%s3842_s17] sm:$0xff] (!%p1002_p2) }
  0x42   : > { %s3710_s22 = smov (!%p1002_p2), 112   ;;  %s4467_s23 = smov (!%p1002_p2), 111   ;;  %v1459_v16 = vld [vmem:[%s3822_s3] sm:$0xff] (!%p1002_p2)  ;;  %v3993_v25 = vsub.s32 (!%p1002_p2), 0, %v1288_v22  ;;  %v3995_v26 = vsub.s32 (!%p1002_p2), 1, %v1288_v22  ;;  %vm1303_vm6 = vcmp.lt.s32.totalorder (!%p1002_p2), %v3989_v23, 16 }
  0x43   : > { %v3983_v18 = vld [vmem:[%s3734_s9] sm:$0x3] (!%p1002_p2)  ;;  %vm1325_vm7 = vcmp.lt.s32.totalorder (!%p1002_p2), %v3989_v23, 15  ;;  %vm1278_vm8 = vcmp.lt.s32.totalorder (!%p1002_p2), %v3989_v23, 17  ;;  %vm1349_vm9 = vcmp.lt.s32.totalorder (!%p1002_p2), %v3989_v23, 1  ;;  %vm1371_vm11 = vcmp.lt.s32.totalorder (!%p1002_p2), %v3989_v23, 127 }
  0x44   : > { %v3986_v19 = vld [vmem:[%s3739_s13] sm:$0x3] (!%p1002_p2)  ;;  %vm1281_vm2 = vcmp.ge.s32.totalorder (!%p1002_p2), %v3983_v18, 1  ;;  %vm1396_vm10 = vcmp.lt.s32.totalorder (!%p1002_p2), %v3983_v18, 15  ;;  %vm1393_vm14 = vcmp.lt.s32.totalorder (!%p1002_p2), %v3989_v23, 113  ;;  %vm1417_vm15 = vcmp.lt.s32.totalorder (!%p1002_p2), %v3989_v23, 112 }
  0x45   : > { %vm1282_vm1 = vcmp.ge.s32.totalorder (!%p1002_p2), %v3986_v19, 1  ;;  %vm1328_vm3 = vcmp.lt.s32.totalorder (!%p1002_p2), %v3986_v19, 15  ;;  %v3448_v28 = vsel (!%p1002_p2), %vm1281_vm2, 1.0, %v3702_v2  ;;  %s3712_s26 = smov (!%p1002_p2), 34  }
  0x46   : > { %s4514_s1 = smov (!%p1091_p3, %s3436_s1), 1  ;;  %vm1283_vm4 = vmand %vm1281_vm2, %vm1282_vm1  ;;  %v3450_v30 = vsel %vm1282_vm1, 1.0, %v3702_v2  ;;  %v4008_v31 = vrot.slane %v3448_v28, %v3993_v25  ;;  %v4011_v32 = vrot.slane %v3448_v28, %v3995_v26  ;;  %v3451_v38 = vsel %vm1328_vm3, 1.0, %v3702_v2 }
  0x47   : > { %s4466_s0 = sshll.u32 %s4514_s1, 4  ;;  %vm1329_vm5 = vmand %vm1281_vm2, %vm1328_vm3  ;;  %v3447_v29 = vsel %vm1283_vm4, 1.0, %v3702_v2  ;;  %v4031_v41 = vrot.slane %v3450_v30, %v3995_v26  ;;  %v4037_v43 = vrot.slane %v3450_v30, %v3993_v25  ;;  %v4044_v48 = vrot.slane %v3451_v38, %v3995_v26 }
  0x48   : > { %s3926_s2 = scalar_lea.vmem %s3729_s5, %s4466_s0  ;;  %v3449_v34 = vsel %vm1329_vm5, 1.0, %v3702_v2  ;;  %v4024_v39 = vrot.slane %v3447_v29, %v3993_v25  ;;  %v4027_v40 = vrot.slane %v3447_v29, %v3995_v26  ;;  %vm1397_vm12 = vmand %vm1396_vm10, %vm1282_vm1  ;;  %v4071_v1 = vrot.slane %v3451_v38, %v3993_v25  ;;  %s3713_s0 = smov 32  }
  0x49   : > { %v3929_v4 = vld [vmem:[%s3926_s2 + $0x8] sm:$0xff]  ;;  %v3932_v5 = vld [vmem:[%s3926_s2] sm:$0xff]  ;;  %v4034_v42 = vrot.slane %v3449_v34, %v3995_v26  ;;  %v4064_v57 = vrot.slane %v3449_v34, %v3993_v25  ;;  %vm1442_vm13 = vmand %vm1396_vm10, %vm1328_vm3  ;;  %vm1439_vm1 = vcmp.lt.s32.totalorder %v3989_v23, 111  ;;  %vm1465_vm2 = vcmask 588800  }
  0x4a   : > { %1199 = vmatprep.subr.mxu1 %v3929_v4  ;;  %1116 = vmatprep.subr.mxu0 %v3929_v4  ;;  %v3454_v28 = vsel %vm1442_vm13, 1.0, %v3702_v2  ;;  %vm1715_vm3 = vcmp.ge.s32.totalorder %v3983_v18, 2  ;;  %vm1716_vm4 = vcmp.ge.s32.totalorder %v3986_v19, 2  ;;  %vm1737_vm13 = vcmp.lt.s32.totalorder %v3989_v23, 32 }
  0x4b   : > { %1200 = vmatpush1.msra.mxu1 %v3932_v5  ;;  %1117 = vmatpush1.msra.mxu0 %v3932_v5  ;;  %vm1717_vm5 = vmand %vm1715_vm3, %vm1716_vm4 }
  0x4c   : > { %3446 = vmatmul.mubr.msk.f32.vlgmr.msra.gmra.mrb[0].mxu1 %vm1112_vm0, %v1189_v6  ;;  %3445 = vmatmul.mubr.msk.f32.vlgmr.msra.gmra.mrb[0].mxu0 %vm1112_vm0, %v1105_v14  ;;  %v3452_v6 = vsel %vm1397_vm12, 1.0, %v3702_v2  ;;  %vm1712_vm12 = vcmp.lt.s32.totalorder %v3989_v23, 34 }
  0x4d   : > { %1616 = vmatprep.mubr.f32.mxu1 %v3702_v2  ;;  %1533 = vmatprep.mubr.f32.mxu0 %v3702_v2 }
  0xbf   : > { %v1194_v7 = vpop.permute.xlu0 %1193 }
 0x11f   : > { %v1265_v8 = vpop.f32.mrb[0].mxu1 }
 0x120   : > { %v1266_v9 = vadd.f32 %v1265_v8, %v1194_v7  ;;  %v1267_v10 = vpop.f32.mrb[1].mxu1 }
 0x121   : > { %v1268_v12 = vadd.f32 %v1267_v10, %v1194_v7 }
 0x122   : > { %v3941_v11 = vmax.f32 %v1266_v9, 0.0 }
 0x123   : > { %v3947_v13 = vmax.f32 %v1268_v12, 0.0  ;;  %v3453_v12 = vsel %vm1396_vm10, 1.0, %v3702_v2  ;;  %vm1762_vm10 = vcmp.lt.s32.totalorder %v3986_v19, 14 }
 0x124   : > { %1299 = vrot.lane.b32.xlu1 %v3941_v11, %s3704_s8  ;;  %1272 = vrot.lane.b32.xlu0 %v3941_v11, %s4469_s7  ;;  %v4097_v22 = vrot.slane %v3453_v12, %v3993_v25 }
 0x128   : > { %1321 = vrot.lane.b32.xlu1 %v3941_v11, %s3706_s10  ;;  %1301 = vrot.lane.b32.xlu0 %v3947_v13, %s3704_s8 }
 0x12c   : > { %1345 = vrot.lane.b32.xlu1 %v3941_v11, %s3707_s15  ;;  %1323 = vrot.lane.b32.xlu0 %v3947_v13, %s3706_s10 }
 0x130   : > { %1274 = vrot.lane.b32.xlu1 %v3947_v13, %s4469_s7  ;;  %1347 = vrot.lane.b32.xlu0 %v3947_v13, %s3707_s15  ;;  %s3715_s7 = smov 2  }
 0x134   : > { %1367 = vrot.lane.b32.xlu1 %v3941_v11, %s3708_s16  ;;  %1369 = vrot.lane.b32.xlu0 %v3947_v13, %s3708_s16 }
 0x138   : > { %1389 = vrot.lane.b32.xlu1 %v3941_v11, %s4471_s18  ;;  %1391 = vrot.lane.b32.xlu0 %v3947_v13, %s4471_s18  ;;  %s3716_s18 = smov 126  }
 0x13c   : > { %1413 = vrot.lane.b32.xlu1 %v3941_v11, %s3710_s22  ;;  %1415 = vrot.lane.b32.xlu0 %v3947_v13, %s3710_s22 }
 0x140   : > { %1435 = vrot.lane.b32.xlu1 %v3941_v11, %s4467_s23  ;;  %1437 = vrot.lane.b32.xlu0 %v3947_v13, %s4467_s23  ;;  %s3714_s23 = smov 30  }
 0x144   : > { %1629 = vperm.xlu0 %3642, %v1626_v15   ;;  %1462 = vperm.xlu1 %3643, %v1459_v16   ;;  %v4089_v15 = vrot.slane %v3452_v6, %v3993_v25 }
 0x196   : > { %v1300_v20 = vpop.permute.xlu1 %1299  ;;  %v1273_v21 = vpop.permute.xlu0 %1272 }
 0x19a   : > { %v1322_v24 = vpop.permute.xlu1 %1321  ;;  %v1302_v27 = vpop.permute.xlu0 %1301 }
 0x19b   : > { %v1304_v36 = vsel %vm1303_vm6, %v1300_v20, %v1302_v27  ;;  %v1305_v37 = vsel %vm1303_vm6, %v1302_v27, %v1300_v20 }
 0x19c   : > { %v1319_v44 = vmul.f32 %v4008_v31, %v1305_v37  ;;  %v1320_v45 = vmul.f32 %v4011_v32, %v1304_v36  ;;  %v4115_v37 = vrot.slane %v3454_v28, %v3995_v26 }
 0x19e   : > { %v1346_v33 = vpop.permute.xlu1 %1345  ;;  %v1324_v35 = vpop.permute.xlu0 %1323 }
 0x19f   : > { %v1326_v49 = vsel %vm1325_vm7, %v1322_v24, %v1324_v35  ;;  %v1327_v58 = vsel %vm1325_vm7, %v1324_v35, %v1322_v24  ;;  %v4100_v24 = vrot.slane %v3453_v12, %v3995_v26 }
 0x1a0   : > { %v1344_v59 = vmul.f32 %v4034_v42, %v1326_v49  ;;  %v1343_v10 = vmul.f32 %v4064_v57, %v1327_v58  ;;  %v4133_v58 = vpop.f32.mrb[0].mxu0 }
 0x1a2   : > { %v1275_v46 = vpop.permute.xlu1 %1274  ;;  %v1348_v47 = vpop.permute.xlu0 %1347 }
 0x1a3   : > { %v1279_v50 = vsel %vm1278_vm8, %v1273_v21, %v1275_v46  ;;  %v1280_v51 = vsel %vm1278_vm8, %v1275_v46, %v1273_v21  ;;  %v1350_v52 = vsel %vm1349_vm9, %v1346_v33, %v1348_v47  ;;  %v1351_v55 = vsel %vm1349_vm9, %v1348_v47, %v1346_v33 }
 0x1a4   : > { %v1297_v53 = vmul.f32 %v4024_v39, %v1280_v51  ;;  %v1298_v54 = vmul.f32 %v4027_v40, %v1279_v50  ;;  %v1366_v56 = vmul.f32 %v4031_v41, %v1350_v52  ;;  %v1365_v0 = vmul.f32 %v4037_v43, %v1351_v55 }
 0x1a5   : > { %v4093_v21 = vrot.slane %v3452_v6, %v3995_v26  ;;  %v4122_v51 = vrot.slane %v3454_v28, %v3993_v25 }
 0x1a6   : > { %v3527_v60 = vpack.c.bf16 %v1319_v44, %v1297_v53  ;;  %v1368_v61 = vpop.permute.xlu1 %1367  ;;  %v1370_v62 = vpop.permute.xlu0 %1369  ;;  %v3525_v63 = vpack.c.bf16 %v1320_v45, %v1298_v54  ;;  %v3529_v9 = vpack.c.bf16 %v1366_v56, %v1344_v59  ;;  %v3531_v17 = vpack.c.bf16 %v1365_v0, %v1343_v10  ;;  %v1458_v56 = vld [vmem:[%s3817_s11] sm:$0xff] }
 0x1a7   : > { %v1373_v3 = vsel %vm1371_vm11, %v1370_v62, %v1368_v61  ;;  %v1372_v7 = vsel %vm1371_vm11, %v1368_v61, %v1370_v62  ;;  %v4135_v59 = vpop.f32.mrb[1].mxu0 }
 0x1a8   : > { %v1388_v8 = vmul.f32 %v4044_v48, %v1373_v3  ;;  %3526 = vmatprep.subr.bf16.mxu0 %v3525_v63  ;;  %v1387_v20 = vmul.f32 %v4071_v1, %v1372_v7  ;;  %v1542_v7 = vld [vmem:[%s3827_s29] sm:$0x3] }
 0x1a9   : > { %3528 = vmatpush1.bf16.msra.mxu0 %v3527_v60 }
 0x1aa   : > { %v1390_v14 = vpop.permute.xlu1 %1389  ;;  %v1392_v16 = vpop.permute.xlu0 %1391  ;;  %3530 = vmatprep.subr.bf16.mxu0 %v3529_v9  ;;  %v3533_v27 = vpack.c.bf16 %v1388_v8, %v3947_v13  ;;  %v3535_v35 = vpack.c.bf16 %v1387_v20, %v3941_v11  ;;  %v1625_v8 = vld [vmem:[%s3837_s21] sm:$0xff] }
 0x1ab   : > { %v1394_v29 = vsel %vm1393_vm14, %v1390_v14, %v1392_v16  ;;  %v1395_v30 = vsel %vm1393_vm14, %v1392_v16, %v1390_v14 }
 0x1ac   : > { %v1411_v38 = vmul.f32 %v4089_v15, %v1394_v29  ;;  %v1412_v44 = vmul.f32 %v4093_v21, %v1395_v30  ;;  %v1893_v29 = vld [vmem:[%s3852_s24] sm:$0xff] }
 0x1ad   : > { %3532 = vmatpush1.bf16.msra.mxu0 %v3531_v17  ;;  %v2059_v30 = vld [vmem:[%s3872_s20] sm:$0xff] }
 0x1ae   : > { %v1414_v33 = vpop.permute.xlu1 %1413  ;;  %v1416_v34 = vpop.permute.xlu0 %1415  ;;  %3534 = vmatprep.subr.bf16.mxu0 %v3533_v27 }
 0x1af   : > { %v1418_v36 = vsel %vm1417_vm15, %v1414_v33, %v1416_v34  ;;  %v1419_v13 = vsel %vm1417_vm15, %v1416_v34, %v1414_v33  ;;  %v3458_v33 = vsel %vm1717_vm5, 1.0, %v3702_v2  ;;  %vm1763_vm5 = vmand %vm1715_vm3, %vm1762_vm10 }
 0x1b0   : > { %v1433_v45 = vmul.f32 %v4097_v22, %v1418_v36  ;;  %v1434_v46 = vmul.f32 %v4100_v24, %v1419_v13  ;;  %v1724_v13 = vrot.slane %v3458_v33, %v3993_v25 }
 0x1b1   : > { %3536 = vmatpush1.bf16.msra.mxu0 %v3535_v35  ;;  %v3459_v35 = vsel %vm1715_vm3, 1.0, %v3702_v2  ;;  %vm1759_vm3 = vcmp.lt.s32.totalorder %v3989_v23, 30 }
 0x1b2   : > { %v3539_v11 = vpack.c.bf16 %v1433_v45, %v1411_v38  ;;  %v1436_v47 = vpop.permute.xlu1 %1435  ;;  %v1438_v49 = vpop.permute.xlu0 %1437  ;;  %v3537_v50 = vpack.c.bf16 %v1434_v46, %v1412_v44  ;;  %v1728_v38 = vrot.slane %v3458_v33, %v3995_v26  ;;  %v1746_v44 = vrot.slane %v3459_v35, %v3993_v25 }
 0x1b3   : > { %v1441_v52 = vsel %vm1439_vm1, %v1438_v49, %v1436_v47  ;;  %v1440_v53 = vsel %vm1439_vm1, %v1436_v47, %v1438_v49  ;;  %v1750_v45 = vrot.slane %v3459_v35, %v3995_v26 }
 0x1b4   : > { %v1457_v54 = vmul.f32 %v4115_v37, %v1441_v52  ;;  %3538 = vmatprep.subr.bf16.mxu0 %v3537_v50  ;;  %v1456_v55 = vmul.f32 %v4122_v51, %v1440_v53  ;;  %v3460_v53 = vsel %vm1763_vm5, 1.0, %v3702_v2  ;;  %vm1830_vm5 = vcmp.lt.s32.totalorder %v3983_v18, 14 }
 0x1b5   : > { %3540 = vmatpush1.bf16.msra.mxu0 %v3539_v11 }
 0x1b6   : > { %1485 = vmatprep.subr.mxu0 %v1457_v54 }
 0x1b9   : > { %1486 = vmatpush1.msra.mxu0 %v1456_v55 }
 0x1ba   : > { %3455 = vmatmul.mubr.msk.f32.vlgmr.msra.gmra.mrb[2].mxu0 %vm1465_vm2, %v1458_v56 }
 0x1bb   : > { %2049 = vmatprep.mubr.f32.mxu0 %v3702_v2 }
 0x1c3   : > { %v1463_v60 = vpop.permute.xlu1 %1462  ;;  %v1630_v12 = vpop.permute.xlu0 %1629 }
 0x28d   : > { %v1535_v61 = vpop.f32.mrb[2].mxu0 }
 0x28e   : > { %v1536_v62 = vadd.f32 %v1535_v61, %v1463_v60  ;;  %v1537_v63 = vpop.f32.mrb[3].mxu0 }
 0x28f   : > { %v1538_v0 = vadd.f32 %v1537_v63, %v1463_v60 }
 0x290   : > { %v1540_v6 = vmax.f32 %v1536_v62, 0.0  ;;  %v3461_v62 = vsel %vm1716_vm4, 1.0, %v3702_v2 }
 0x291   : > { %v1541_v3 = vmax.f32 %v1538_v0, 0.0 }
 0x293   : > { %1552 = vmatprep.subr.mxu1 %v1541_v3 }
 0x294   : > { %1553 = vmatpush1.msra.mxu1 %v1540_v6  ;;  %v1770_v6 = vrot.slane %v3460_v53, %v3993_v25 }
 0x295   : > { %3456 = vmatmul.mubr.msk.f32.vlgmr.msra.gmra.mrb[2].mxu1 %vm1112_vm0, %v1542_v7  ;;  %1635 = vmatprep.subr.mxu1 %v3929_v4  ;;  %v1774_v7 = vrot.slane %v3460_v53, %v3995_v26 }
 0x296   : > { %1636 = vmatpush1.msra.mxu1 %v3932_v5  ;;  %1699 = vmatprep.mubr.f32.mxu1 %v3702_v2 }
 0x299   : > { %3457 = vmatmul.mubr.msk.f32.vlgmr.msra.gmra.mrb[4].mxu1 %vm1112_vm0, %v1625_v8  ;;  %v1792_v8 = vrot.slane %v3461_v62, %v3993_v25 }
 0x29a   : > { %1966 = vmatprep.mubr.f32.mxu1 %v3702_v2 }
 0x368   : > { %v4145_v9 = vpop.f32.mrb[2].mxu1 }
 0x369   : > { %v4147_v10 = vpop.f32.mrb[3].mxu1 }
 0x36c   : > { %v1701_v14 = vpop.f32.mrb[4].mxu1 }
 0x36d   : > { %v1702_v16 = vadd.f32 %v1701_v14, %v1630_v12  ;;  %v1703_v17 = vpop.f32.mrb[5].mxu1  ;;  %v3462_v14 = vsel %vm1762_vm10, 1.0, %v3702_v2 }
 0x36e   : > { %v1704_v20 = vadd.f32 %v1703_v17, %v1630_v12  ;;  %v1796_v12 = vrot.slane %v3461_v62, %v3995_v26  ;;  %v1818_v35 = vrot.slane %v3462_v14, %v3995_v26 }
 0x36f   : > { %v4149_v27 = vmax.f32 %v1702_v16, 0.0 }
 0x370   : > { %v4151_v28 = vmax.f32 %v1704_v20, 0.0 }
 0x371   : > { %1708 = vrot.lane.b32.xlu1 %v4149_v27, %s3712_s26 }
 0x372   : > { %1710 = vrot.lane.b32.xlu0 %v4151_v28, %s3712_s26  ;;  %s3717_s26 = smov 98  }
 0x375   : > { %1733 = vrot.lane.b32.xlu1 %v4149_v27, %s3713_s0 }
 0x376   : > { %1735 = vrot.lane.b32.xlu0 %v4151_v28, %s3713_s0  ;;  %s3718_s0 = smov 96  }
 0x379   : > { %1755 = vrot.lane.b32.xlu1 %v4149_v27, %s3714_s23 }
 0x37a   : > { %1757 = vrot.lane.b32.xlu0 %v4151_v28, %s3714_s23  ;;  %s3719_s23 = smov 94  }
 0x37d   : > { %1779 = vrot.lane.b32.xlu1 %v4149_v27, %s3715_s7 }
 0x37e   : > { %1781 = vrot.lane.b32.xlu0 %v4151_v28, %s3715_s7  ;;  %s4491_s7 = sld [smem:[#allocation15_spill]] }
 0x381   : > { %1801 = vrot.lane.b32.xlu1 %v4149_v27, %s3716_s18 }
 0x382   : > { %1803 = vrot.lane.b32.xlu0 %v4151_v28, %s3716_s18  ;;  %s4492_s18 = sld [smem:[#allocation17_spill]] }
 0x385   : > { %1823 = vrot.lane.b32.xlu1 %v4149_v27, %s3717_s26 }
 0x386   : > { %1825 = vrot.lane.b32.xlu0 %v4151_v28, %s3717_s26  ;;  %s4493_s26 = sld [smem:[#allocation19_spill]] }
 0x389   : > { %1847 = vrot.lane.b32.xlu1 %v4149_v27, %s3718_s0 }
 0x38a   : > { %1849 = vrot.lane.b32.xlu0 %v4151_v28, %s3718_s0  ;;  %s4494_s0 = sld [smem:[#allocation18_spill]] }
 0x38d   : > { %1869 = vrot.lane.b32.xlu1 %v4149_v27, %s3719_s23 }
 0x38e   : > { %1871 = vrot.lane.b32.xlu0 %v4151_v28, %s3719_s23  ;;  %s4495_s23 = sld [smem:[#allocation14_spill]] }
 0x391   : > { %1896 = vperm.xlu1 %3643, %v1893_v29  }
 0x392   : > { %2062 = vperm.xlu0 %3642, %v2059_v30  }
 0x3e3   : > { %v1709_v34 = vpop.permute.xlu1 %1708 }
 0x3e4   : > { %v1711_v36 = vpop.permute.xlu0 %1710 }
 0x3e5   : > { %v1713_v46 = vsel %vm1712_vm12, %v1709_v34, %v1711_v36  ;;  %v1714_v11 = vsel %vm1712_vm12, %v1711_v36, %v1709_v34  ;;  %vm1783_vm12 = vcmp.lt.s32.totalorder %v3989_v23, 2  ;;  %v1814_v34 = vrot.slane %v3462_v14, %v3993_v25 }
 0x3e6   : > { %v1731_v54 = vmul.f32 %v1724_v13, %v1714_v11  ;;  %v1732_v55 = vmul.f32 %v1728_v38, %v1713_v46 }
 0x3e7   : > { %v1734_v47 = vpop.permute.xlu1 %1733 }
 0x3e8   : > { %v1736_v49 = vpop.permute.xlu0 %1735 }
 0x3e9   : > { %v1738_v50 = vsel %vm1737_vm13, %v1734_v47, %v1736_v49  ;;  %v1739_v52 = vsel %vm1737_vm13, %v1736_v49, %v1734_v47  ;;  %vm1805_vm13 = vcmp.lt.s32.totalorder %v3989_v23, 126 }
 0x3ea   : > { %v1753_v56 = vmul.f32 %v1746_v44, %v1739_v52  ;;  %v1754_v60 = vmul.f32 %v1750_v45, %v1738_v50 }
 0x3eb   : > { %v1756_v61 = vpop.permute.xlu1 %1755 }
 0x3ec   : > { %v3543_v63 = vpack.c.bf16 %v1753_v56, %v1731_v54  ;;  %v1758_v0 = vpop.permute.xlu0 %1757  ;;  %v3541_v3 = vpack.c.bf16 %v1754_v60, %v1732_v55  ;;  %v3464_v56 = vsel %vm1830_vm5, 1.0, %v3702_v2 }
 0x3ed   : > { %v1760_v16 = vsel %vm1759_vm3, %v1756_v61, %v1758_v0  ;;  %v1761_v17 = vsel %vm1759_vm3, %v1758_v0, %v1756_v61  ;;  %vm1831_vm3 = vmand %vm1830_vm5, %vm1716_vm4  ;;  %v1864_v19 = vrot.slane %v3464_v56, %v3995_v26 }
 0x3ee   : > { %3542 = vmatprep.subr.bf16.mxu1 %v3541_v3  ;;  %v1777_v36 = vmul.f32 %v1770_v6, %v1761_v17  ;;  %v1778_v13 = vmul.f32 %v1774_v7, %v1760_v16  ;;  %v3463_v54 = vsel %vm1831_vm3, 1.0, %v3702_v2  ;;  %vm1876_vm4 = vmand %vm1830_vm5, %vm1762_vm10  ;;  %v1860_v3 = vrot.slane %v3464_v56, %v3993_v25 }
 0x3ef   : > { %3544 = vmatpush1.bf16.msra.mxu1 %v3543_v63  ;;  %v1780_v20 = vpop.permute.xlu1 %1779  ;;  %v1838_v63 = vrot.slane %v3463_v54, %v3993_v25  ;;  %v1842_v0 = vrot.slane %v3463_v54, %v3995_v26  ;;  %v3465_v18 = vsel %vm1876_vm4, 1.0, %v3702_v2  ;;  %vm1873_vm10 = vcmp.lt.s32.totalorder %v3989_v23, 94  ;;  %v1975_v54 = vld [vmem:[%s4491_s7] sm:$0x3]  ;;  %s4496_s7 = sld [smem:[#allocation13_spill]] }
 0x3f0   : > { %v1782_v29 = vpop.permute.xlu0 %1781  ;;  %v1887_v14 = vrot.slane %v3465_v18, %v3995_v26  ;;  %v1892_v26 = vld [vmem:[%s3847_s30] sm:$0xff]  ;;  %vm2429_vm5 = vcmask 1041408   ;;  %vm2425_vm3 = vcmask 15360   ;;  %vm3720_vm4 = vmmov 0  }
 0x3f1   : > { %v1784_v30 = vsel %vm1783_vm12, %v1780_v20, %v1782_v29  ;;  %v1785_v33 = vsel %vm1783_vm12, %v1782_v29, %v1780_v20  ;;  %vm1827_vm12 = vcmp.lt.s32.totalorder %v3989_v23, 98 }
 0x3f2   : > { %v1799_v38 = vmul.f32 %v1792_v8, %v1785_v33  ;;  %v1800_v44 = vmul.f32 %v1796_v12, %v1784_v30 }
 0x3f3   : > { %v1802_v45 = vpop.permute.xlu1 %1801 }
 0x3f4   : > { %v3547_v46 = vpack.c.bf16 %v1799_v38, %v1777_v36  ;;  %v1804_v11 = vpop.permute.xlu0 %1803  ;;  %v3545_v47 = vpack.c.bf16 %v1800_v44, %v1778_v13  ;;  %v1883_v36 = vrot.slane %v3465_v18, %v3993_v25 }
 0x3f5   : > { %v1806_v49 = vsel %vm1805_vm13, %v1802_v45, %v1804_v11  ;;  %v1807_v50 = vsel %vm1805_vm13, %v1804_v11, %v1802_v45  ;;  %vm1851_vm13 = vcmp.lt.s32.totalorder %v3989_v23, 96 }
 0x3f6   : > { %v1821_v52 = vmul.f32 %v1814_v34, %v1806_v49  ;;  %v1822_v53 = vmul.f32 %v1818_v35, %v1807_v50  ;;  %3546 = vmatprep.subr.bf16.mxu1 %v3545_v47 }
 0x3f7   : > { %3548 = vmatpush1.bf16.msra.mxu1 %v3547_v46  ;;  %v1824_v55 = vpop.permute.xlu1 %1823 }
 0x3f8   : > { %v3551_v60 = vpack.c.bf16 %v1821_v52, %v4149_v27  ;;  %v1826_v61 = vpop.permute.xlu0 %1825  ;;  %v3549_v62 = vpack.c.bf16 %v1822_v53, %v4151_v28 }
 0x3f9   : > { %v1828_v6 = vsel %vm1827_vm12, %v1824_v55, %v1826_v61  ;;  %v1829_v27 = vsel %vm1827_vm12, %v1826_v61, %v1824_v55  ;;  %v2058_v55 = vld [vmem:[%s4492_s18] sm:$0xff]  ;;  %s4497_s18 = sld [smem:[#allocation16_spill]] }
 0x3fa   : > { %3550 = vmatprep.subr.bf16.mxu1 %v3549_v62  ;;  %v1845_v16 = vmul.f32 %v1838_v63, %v1828_v6  ;;  %v1846_v17 = vmul.f32 %v1842_v0, %v1829_v27 }
 0x3fb   : > { %3552 = vmatpush1.bf16.msra.mxu1 %v3551_v60  ;;  %v1848_v7 = vpop.permute.xlu1 %1847 }
 0x3fc   : > { %v1850_v8 = vpop.permute.xlu0 %1849 }
 0x3fd   : > { %v1852_v12 = vsel %vm1851_vm13, %v1848_v7, %v1850_v8  ;;  %v1853_v28 = vsel %vm1851_vm13, %v1850_v8, %v1848_v7 }
 0x3fe   : > { %v1867_v20 = vmul.f32 %v1860_v3, %v1852_v12  ;;  %v1868_v29 = vmul.f32 %v1864_v19, %v1853_v28 }
 0x3ff   : > { %v1870_v30 = vpop.permute.xlu1 %1869 }
 0x400   : > { %v3555_v33 = vpack.c.bf16 %v1867_v20, %v1845_v16  ;;  %v1872_v34 = vpop.permute.xlu0 %1871  ;;  %v3553_v35 = vpack.c.bf16 %v1868_v29, %v1846_v17 }
 0x401   : > { %v1875_v13 = vsel %vm1873_vm10, %v1872_v34, %v1870_v30  ;;  %v1874_v38 = vsel %vm1873_vm10, %v1870_v30, %v1872_v34  ;;  %v2157_v34 = vld [vmem:[%s4494_s0] sm:$0xff]  ;;  %s4499_s0 = sld [smem:[#allocation20_spill]] }
 0x402   : > { %v1891_v44 = vmul.f32 %v1887_v14, %v1875_v13  ;;  %3554 = vmatprep.subr.bf16.mxu1 %v3553_v35  ;;  %v1890_v45 = vmul.f32 %v1883_v36, %v1874_v38 }
 0x403   : > { %3556 = vmatpush1.bf16.msra.mxu1 %v3555_v33 }
 0x404   : > { %1918 = vmatprep.subr.mxu1 %v1891_v44 }
 0x407   : > { %1919 = vmatpush1.msra.mxu1 %v1890_v45 }
 0x408   : > { %3466 = vmatmul.mubr.msk.f32.vlgmr.msra.gmra.mrb[6].mxu1 %vm1465_vm2, %v1892_v26  ;;  %vm2164_vm2 = vcmask 195584  }
 0x409   : > { %2331 = vmatprep.mubr.f32.mxu1 %v3702_v2 }
 0x410   : > { %v1897_v46 = vpop.permute.xlu1 %1896 }
 0x411   : > { %v2063_v61 = vpop.permute.xlu0 %2062 }
 0x4db   : > { %v1968_v11 = vpop.f32.mrb[6].mxu1 }
 0x4dc   : > { %v1969_v47 = vadd.f32 %v1968_v11, %v1897_v46  ;;  %v1970_v49 = vpop.f32.mrb[7].mxu1  ;;  %v1543_v11 = vld [vmem:[%s4495_s23] sm:$0x3]  ;;  %s4500_s23 = sld [smem:[#allocation9_spill]] }
 0x4dd   : > { %v1971_v50 = vadd.f32 %v1970_v49, %v1897_v46  ;;  %v2258_v46 = vld [vmem:[%s3892_s14] sm:$0xff] }
 0x4de   : > { %v1973_v53 = vmax.f32 %v1969_v47, 0.0  ;;  %v1106_v47 = vld [vmem:[%s4496_s7] sm:$0x3]  ;;  %s4501_s7 = sld [smem:[#allocation8_spill]] }
 0x4df   : > { %v1974_v52 = vmax.f32 %v1971_v50, 0.0  ;;  %v1976_v49 = vld [vmem:[%s4497_s18] sm:$0x3]  ;;  %s4502_s18 = sld [smem:[#allocation10_spill]] }
 0x4e0   : > { %v2341_v50 = vld [vmem:[%s3902_s19] sm:$0x3] }
 0x4e1   : > { %1985 = vmatprep.subr.mxu0 %v1974_v52 }
 0x4e2   : > { %1986 = vmatpush1.msra.mxu0 %v1973_v53 }
 0x4e3   : > { %3467 = vmatmul.mubr.msk.f32.vlgmr.msra.gmra.mrb[4].mxu0 %vm1112_vm0, %v1975_v54  ;;  %2068 = vmatprep.subr.mxu0 %v3929_v4 }
 0x4e4   : > { %2069 = vmatpush1.msra.mxu0 %v3932_v5  ;;  %2132 = vmatprep.mubr.f32.mxu0 %v3702_v2  ;;  %v2158_v5 = vld [vmem:[%s4493_s26] sm:$0xff]  ;;  %s4498_s26 = sld [smem:[#allocation12_spill]] }
 0x4e7   : > { %3468 = vmatmul.mubr.msk.f32.vlgmr.msra.gmra.mrb[6].mxu0 %vm1112_vm0, %v2058_v55 }
 0x4e8   : > { %2232 = vmatprep.mubr.f32.mxu0 %v3702_v2 }
 0x4ea   : > { %v2753_v52 = vld [vmem:[%s4498_s26] sm:$0xff]  ;;  %s4503_s26 = sld [smem:[#allocation11_spill]] }
 0x5b6   : > { %v4242_v56 = vpop.f32.mrb[4].mxu0 }
 0x5b7   : > { %v4244_v60 = vpop.f32.mrb[5].mxu0 }
 0x5ba   : > { %v2134_v62 = vpop.f32.mrb[6].mxu0 }
 0x5bb   : > { %v2135_v63 = vadd.f32 %v2134_v62, %v2063_v61  ;;  %v2136_v0 = vpop.f32.mrb[7].mxu0 }
 0x5bc   : > { %v2137_v3 = vadd.f32 %v2136_v0, %v2063_v61 }
 0x5bd   : > { %v2139_v4 = vmax.f32 %v2135_v63, 0.0 }
 0x5be   : > { %v2140_v19 = vmax.f32 %v2137_v3, 0.0 }
 0x5bf   : > { %2141 = vrot.lane.b32.xlu1 %v2139_v4, %s3707_s15 }
 0x5c0   : > { %2143 = vrot.lane.b32.xlu0 %v2140_v19, %s3707_s15 }
 0x5c3   : > { %2149 = vrot.lane.b32.xlu1 %v2139_v4, %s3708_s16 }
 0x5c4   : > { %2151 = vrot.lane.b32.xlu0 %v2140_v19, %s3708_s16 }
 0x5c7   : > { %2161 = vperm.xlu1 %3643, %v2158_v5  }
 0x631   : > { %v2142_v18 = vpop.permute.xlu1 %2141 }
 0x632   : > { %v2144_v6 = vpop.permute.xlu0 %2143 }
 0x633   : > { %v2145_v27 = vsel %vm1349_vm9, %v2142_v18, %v2144_v6  ;;  %v2146_v7 = vsel %vm1349_vm9, %v2144_v6, %v2142_v18 }
 0x634   : > { %v2147_v8 = vmul.f32 %v2146_v7, %v4037_v43  ;;  %v2148_v12 = vmul.f32 %v2145_v27, %v4031_v41  ;;  %v2257_v7 = vld [vmem:[%s4499_s0] sm:$0xff]  ;;  %s4504_s0 = sld [smem:[#allocation3_spill]] }
 0x635   : > { %v2150_v28 = vpop.permute.xlu1 %2149 }
 0x636   : > { %v3559_v14 = vpack.c.bf16 %v2139_v4, %v2147_v8  ;;  %v2152_v16 = vpop.permute.xlu0 %2151  ;;  %v3557_v17 = vpack.c.bf16 %v2140_v19, %v2148_v12 }
 0x637   : > { %v2154_v20 = vsel %vm1371_vm11, %v2152_v16, %v2150_v28  ;;  %v2153_v29 = vsel %vm1371_vm11, %v2150_v28, %v2152_v16 }
 0x638   : > { %v2156_v30 = vmul.f32 %v2154_v20, %v4044_v48  ;;  %3558 = vmatprep.subr.bf16.mxu0 %v3557_v17  ;;  %v2155_v33 = vmul.f32 %v2153_v29, %v4071_v1 }
 0x639   : > { %3560 = vmatpush1.bf16.msra.mxu0 %v3559_v14 }
 0x63a   : > { %2172 = vmatprep.subr.mxu0 %v2156_v30 }
 0x63d   : > { %2173 = vmatpush1.msra.mxu0 %v2155_v33 }
 0x63e   : > { %3469 = vmatmul.mubr.msk.f32.vlgmr.msra.gmra.mrb[8].mxu0 %vm2164_vm2, %v2157_v34  ;;  %v2424_v34 = vld [vmem:[%s4500_s23] sm:$0xff]  ;;  %s4505_s23 = sld [smem:[#allocation4_spill]] }
 0x63f   : > { %2414 = vmatprep.mubr.f32.mxu0 %v3702_v2 }
 0x646   : > { %v2162_v35 = vpop.permute.xlu1 %2161 }
 0x711   : > { %v2234_v36 = vpop.f32.mrb[8].mxu0 }
 0x712   : > { %v2235_v13 = vadd.f32 %v2234_v36, %v2162_v35  ;;  %v2236_v38 = vpop.f32.mrb[9].mxu0 }
 0x713   : > { %v2237_v44 = vadd.f32 %v2236_v38, %v2162_v35 }
 0x714   : > { %v2239_v45 = vmax.f32 %v2235_v13, 0.0 }
 0x715   : > { %v2240_v26 = vmax.f32 %v2237_v44, 0.0 }
 0x716   : > { %2241 = vrot.lane.b32.xlu0 %v2239_v45, %s3704_s8 }
 0x717   : > { %2243 = vrot.lane.b32.xlu1 %v2240_v26, %s3704_s8 }
 0x71a   : > { %2249 = vrot.lane.b32.xlu0 %v2239_v45, %s3710_s22 }
 0x71b   : > { %2251 = vrot.lane.b32.xlu1 %v2240_v26, %s3710_s22 }
 0x71e   : > { %2261 = vperm.xlu0 %3642, %v2258_v46  }
 0x71f   : > { %1546 = vperm.xlu1 %3643, %v1543_v11   ;;  %v2340_v11 = vld [vmem:[%s3897_s25] sm:$0x3] }
 0x722   : > { %1109 = vperm.xlu0 %3642, %v1106_v47  }
 0x723   : > { %1979 = vperm.xlu1 %3643, %v1976_v49  }
 0x726   : > { %2344 = vperm.xlu0 %3642, %v2341_v50  }
 0x727   : > { %2756 = vperm.xlu1 %3643, %v2753_v52  }
 0x788   : > { %v2242_v53 = vpop.permute.xlu0 %2241 }
 0x789   : > { %v2244_v54 = vpop.permute.xlu1 %2243 }
 0x78a   : > { %v2245_v55 = vsel %vm1303_vm6, %v2242_v53, %v2244_v54  ;;  %v2246_v61 = vsel %vm1303_vm6, %v2244_v54, %v2242_v53 }
 0x78b   : > { %v2247_v62 = vmul.f32 %v2246_v61, %v4008_v31  ;;  %v2248_v63 = vmul.f32 %v2245_v55, %v4011_v32  ;;  %v2670_v61 = vld [vmem:[%s4503_s26] sm:$0xff]  ;;  %s4508_s26 = smov 113  }
 0x78c   : > { %v2250_v0 = vpop.permute.xlu0 %2249 }
 0x78d   : > { %v3563_v3 = vpack.c.bf16 %v2239_v45, %v2247_v62  ;;  %v2252_v4 = vpop.permute.xlu1 %2251  ;;  %v3561_v19 = vpack.c.bf16 %v2240_v26, %v2248_v63 }
 0x78e   : > { %v2254_v5 = vsel %vm1417_vm15, %v2252_v4, %v2250_v0  ;;  %v2253_v18 = vsel %vm1417_vm15, %v2250_v0, %v2252_v4 }
 0x78f   : > { %v2256_v6 = vmul.f32 %v2254_v5, %v4100_v24  ;;  %3562 = vmatprep.subr.bf16.mxu1 %v3561_v19  ;;  %v2255_v27 = vmul.f32 %v2253_v18, %v4097_v22 }
 0x790   : > { %3564 = vmatpush1.bf16.msra.mxu1 %v3563_v3 }
 0x791   : > { %2271 = vmatprep.subr.mxu1 %v2256_v6 }
 0x794   : > { %2272 = vmatpush1.msra.mxu1 %v2255_v27  ;;  %v2769_v27 = vld [vmem:[%s4504_s0] sm:$0x3]  ;;  %s4509_s0 = smov 17  }
 0x795   : > { %3470 = vmatmul.mubr.msk.f32.vlgmr.msra.gmra.mrb[8].mxu1 %vm2164_vm2, %v2257_v7  ;;  %v2770_v7 = vld [vmem:[%s4505_s23] sm:$0x3] }
 0x796   : > { %2500 = vmatprep.mubr.f32.mxu1 %v3702_v2 }
 0x79d   : > { %v2262_v8 = vpop.permute.xlu0 %2261 }
 0x79e   : > { %v1547_v12 = vpop.permute.xlu1 %1546 }
 0x79f   : > { %v1619_v28 = vadd.f32 %v4145_v9, %v1547_v12  ;;  %v1621_v14 = vadd.f32 %v4147_v10, %v1547_v12 }
 0x7a1   : > { %v1623_v16 = vmax.f32 %v1619_v28, 0.0  ;;  %v1624_v17 = vmax.f32 %v1621_v14, 0.0  ;;  %v1110_v20 = vpop.permute.xlu0 %1109 }
 0x7a2   : > { %v1183_v29 = vadd.f32 %v4133_v58, %v1110_v20  ;;  %v1185_v30 = vadd.f32 %v4135_v59, %v1110_v20  ;;  %v1980_v33 = vpop.permute.xlu1 %1979  ;;  %v2423_v59 = vld [vmem:[%s4501_s7] sm:$0xff]  ;;  %s4506_s7 = sld [smem:[#allocation5_spill]] }
 0x7a3   : > { %v2054_v35 = vadd.f32 %v4244_v60, %v1980_v33  ;;  %3472 = vmatprep.subr.msk.mxu1 %vm2429_vm5, %v1624_v17  ;;  %v2052_v58 = vadd.f32 %v4242_v56, %v1980_v33  ;;  %v2587_v56 = vld [vmem:[%s4502_s18] sm:$0xff]  ;;  %s4507_s18 = sld [smem:[#allocation6_spill]] }
 0x7a4   : > { %v1187_v36 = vmax.f32 %v1183_v29, 0.0  ;;  %v1188_v9 = vmax.f32 %v1185_v30, 0.0  ;;  %3473 = vmatpush1.msk.msra.mxu1 %vm2429_vm5, %v1623_v16 }
 0x7a5   : > { %v2057_v10 = vmax.f32 %v2054_v35, 0.0  ;;  %3474 = vmatmul.mubr.msk.f32.vlgmr.msra.gmra.mrb[10].mxu1 %vm2425_vm3, %v2424_v34  ;;  %v2056_v60 = vmax.f32 %v2052_v58, 0.0  ;;  %v2345_v47 = vpop.permute.xlu0 %2344 }
 0x7a6   : > { %3475 = vmatprep.subr.msk.mxu1 %vm2429_vm5, %v1188_v9  ;;  %2580 = vmatprep.mubr.f32.mxu1 %v3702_v2  ;;  %v2757_v62 = vpop.permute.xlu1 %2756 }
 0x7a7   : > { %3476 = vmatpush1.msk.msra.mxu1 %vm2429_vm5, %v1187_v36 }
 0x7a8   : > { %3478 = vmatprep.subr.msk.mxu1 %vm2429_vm5, %v2057_v10  ;;  %v2845_v16 = vld [vmem:[%s4506_s7] sm:$0xff] }
 0x7a9   : > { %v2846_v34 = vld [vmem:[%s4507_s18] sm:$0xff] }
 0x7aa   : > { %v3569_v35 = vadd.f32 %v2846_v34, %v2846_v34 }
 0x7ad   : > { %3477 = vmatmul.mubr.msk.f32.vlgmr.msra.gmra.mrb[10].mxu1 %vm2425_vm3, %v2423_v59 }
 0x7ae   : > { %3479 = vmatpush1.msk.msra.mxu1 %vm2429_vm5, %v2056_v60  ;;  %2661 = vmatprep.mubr.f32.mxu1 %v3702_v2 }
 0x7b5   : > { %3480 = vmatmul.mubr.msk.f32.vlgmr.msra.gmra.mrb[10].mxu1 %vm2425_vm3, %v2587_v56 }
 0x7b6   : > { %2744 = vmatprep.mubr.f32.mxu1 %v3702_v2 }
 0x868   : > { %v2333_v13 = vpop.f32.mrb[8].mxu1 }
 0x869   : > { %v2334_v38 = vadd.f32 %v2333_v13, %v2262_v8  ;;  %v2335_v44 = vpop.f32.mrb[9].mxu1 }
 0x86a   : > { %v2336_v45 = vadd.f32 %v2335_v44, %v2262_v8 }
 0x86b   : > { %v2338_v46 = vmax.f32 %v2334_v38, 0.0 }
 0x86c   : > { %v2339_v26 = vmax.f32 %v2336_v45, 0.0 }
 0x86e   : > { %2350 = vmatprep.subr.mxu0 %v2339_v26 }
 0x86f   : > { %2351 = vmatpush1.msra.mxu0 %v2338_v46 }
 0x870   : > { %3471 = vmatmul.mubr.msk.f32.vlgmr.msra.gmra.mrb[10].mxu0 %vm1112_vm0, %v2340_v11  ;;  %3505 = vmatprep.subr.mxu0 %v3702_v2 }
 0x871   : > { %3507 = vmatprep.mubr.msk.f32.mxu0 %vm3720_vm4, %v3702_v2 }
 0x943   : > { %v2416_v49 = vpop.f32.mrb[10].mxu0 }
 0x944   : > { %v2417_v50 = vadd.f32 %v2416_v49, %v2345_v47  ;;  %v2418_v52 = vpop.f32.mrb[11].mxu0 }
 0x945   : > { %v2419_v53 = vadd.f32 %v2418_v52, %v2345_v47 }
 0x946   : > { %v2421_v55 = vmax.f32 %v2417_v50, 0.0 }
 0x947   : > { %v2422_v54 = vmax.f32 %v2419_v53, 0.0 }
 0x949   : > { %3481 = vmatprep.subr.msk.mxu1 %vm2429_vm5, %v2422_v54 }
 0x94a   : > { %3482 = vmatpush1.msk.msra.mxu1 %vm2429_vm5, %v2421_v55 }
 0x94b   : > { %3483 = vmatmul.mubr.msk.f32.vlgmr.msra.gmra.mrb[10].mxu1 %vm2425_vm3, %v2670_v61 }
 0x94c   : > { %3310 = vmatprep.mubr.f32.mxu1 %v3702_v2 }
 0xa1e   : > { %v2746_v63 = vpop.f32.mrb[10].mxu1 }
 0xa1f   : > { %v2759_v0 = vadd.f32 %v2757_v62, %v2746_v63  ;;  %v2748_v3 = vpop.f32.mrb[11].mxu1 }
 0xa20   : > { %v2760_v4 = vadd.f32 %v2757_v62, %v2748_v3 }
 0xa22   : > { %v2766_v19 = vmax.f32 %v2759_v0, %v2760_v4  ;;  %v2761_v5 = vadd.f32 %v2760_v4, %v2759_v0 }
 0xa24   : > { %2767 = vmax.xlane.f32.xlu1 %v2766_v19  ;;  %2762 = vadd.xlane.f32.xlu0 %v2761_v5 }
 0xab1   : > { %v2763_v18 = vpop.xlane.xlu0 %2762  ;;  %v2768_v17 = vpop.xlane.xlu1 %2767 }
 0xab2   : > { %v2765_v6 = vmul.f32 0.00390625, %v2763_v18 }
 0xab4   : > { %3506 = vmatpush3.msra.mxu0 %v2765_v6 }
 0xab5   : > { %3508 = vmatmul.mubr.msk.f32.vlgmr.msra.gmra.mrb[12].mxu0 %vm1112_vm0, %v2769_v27  ;;  %3510 = vmatprep.subr.mxu0 %v3702_v2 }
 0xab6   : > { %3512 = vmatprep.mubr.msk.f32.mxu0 %vm3720_vm4, %v3702_v2 }
 0xb88   : > { %v2840_v8 = vpop.f32.mrb[12].mxu0 }
 0xb89   : > { %v2841_v12 = vadd.f32 %v2840_v8, %v2770_v7  ;;  %v3509_v28 = vpop.f32.mrb[13].mxu0 }
 0xb8b   : > { %v2844_v14 = vmax.f32 %v2841_v12, 0.0 }
 0xb8d   : > { %3511 = vmatpush3.msk.msra.mxu0 %vm2429_vm5, %v2844_v14  ;;  %v3226_v14 = vld [vmem:[#allocation2] sm:$0x1] }
 0xb8e   : > { %3513 = vmatmul.mubr.msk.f32.vlgmr.msra.gmra.mrb[14].mxu0 %vm2425_vm3, %v2845_v16  ;;  %3515 = vmatprep.subr.mxu0 %v3702_v2 }
 0xb8f   : > { %3516 = vmatpush3.msra.mxu0 %v2768_v17  ;;  %3517 = vmatprep.mubr.msk.f32.mxu0 %vm3720_vm4, %v3702_v2 }
 0xb90   : > { %3520 = vmatprep.subr.mxu0 %v3702_v2 }
 0xb92   : > { %3518 = vmatmul.mubr.msk.f32.vlgmr.msra.gmra.mrb[16].mxu0 %vm1112_vm0, %v2769_v27  ;;  %vm3108_vm0 = vcmask 1040384  }
 0xb93   : > { %3522 = vmatprep.mubr.msk.f32.mxu0 %vm3720_vm4, %v3702_v2 }
 0xc65   : > { %v2989_v20 = vpop.f32.mrb[16].mxu0 }
 0xc66   : > { %v2990_v29 = vadd.f32 %v2989_v20, %v2770_v7  ;;  %v3519_v30 = vpop.f32.mrb[17].mxu0 }
 0xc68   : > { %v2993_v33 = vmax.f32 %v2990_v29, 0.0 }
 0xc6a   : > { %3521 = vmatpush3.msk.msra.mxu0 %vm2429_vm5, %v2993_v33 }
 0xc6b   : > { %3523 = vmatmul.mubr.msk.f32.vlgmr.msra.gmra.mrb[14].mxu0 %vm2425_vm3, %v2845_v16 }
 0xd3e   : > { %v3063_v36 = vpop.f32.mrb[14].mxu0 }
 0xd3f   : > { %v3570_v9 = vadd.f32 %v3569_v35, %v3063_v36  ;;  %v3524_v10 = vpop.f32.mrb[15].mxu0 }
 0xd41   : > { %v3068_v58 = vsub.f32 0.0, %v3570_v9 }
 0xd43   : > { %v3069_v59 = vmul.f32 1.442695, %v3068_v58 }
 0xd45   : > { %3644 = vpow2.f32 %v3069_v59 }
 0xd4f   : > { %v3645_v60 = vpop.eup %3644 }
 0xd50   : > { %v3071_v13 = vadd.f32 1.0, %v3645_v60 }
 0xd52   : > { %3646 = vrcp.f32 %v3071_v13 }
 0xd5c   : > { %v3647_v2 = vpop.eup %3646 }
 0xd5d   : > { %3076 = vperm.xlu0 %3642, %v3647_v2  }
 0xddc   : > { %v3077_v38 = vpop.permute.xlu0 %3076 }
 0xddd   : > { %v4341_v44 = vmul.f32 %v3077_v38, %v2759_v0  ;;  %v4343_v45 = vmul.f32 %v3077_v38, %v2760_v4 }
 0xddf   : > { %v3081_v26 = vrot.slane %v4341_v44, 4  ;;  %v3087_v46 = vrot.slane %v4343_v45, 4 }
 0xde1   : > { %v3082_v11 = vadd.f32 %v3081_v26, %v4341_v44  ;;  %v3088_v56 = vadd.f32 %v3087_v46, %v4343_v45  ;;  %v3097_v47 = vmax.f32 %v4341_v44, %v3081_v26  ;;  %v3103_v49 = vmax.f32 %v4343_v45, %v3087_v46 }
 0xde3   : > { %v3083_v50 = vrot.slane %v3082_v11, 2  ;;  %v3089_v52 = vrot.slane %v3088_v56, 2  ;;  %v3098_v53 = vrot.slane %v3097_v47, 2  ;;  %v3104_v54 = vrot.slane %v3103_v49, 2 }
 0xde5   : > { %v3084_v55 = vadd.f32 %v3083_v50, %v3082_v11  ;;  %v3090_v61 = vadd.f32 %v3089_v52, %v3088_v56  ;;  %v3099_v62 = vmax.f32 %v3097_v47, %v3098_v53  ;;  %v3105_v63 = vmax.f32 %v3103_v49, %v3104_v54 }
 0xde7   : > { %v3085_v0 = vrot.slane %v3084_v55, 1  ;;  %v3091_v3 = vrot.slane %v3090_v61, 1  ;;  %v3100_v4 = vrot.slane %v3099_v62, 1  ;;  %v3106_v19 = vrot.slane %v3105_v63, 1 }
 0xde9   : > { %v3086_v5 = vadd.f32 %v3085_v0, %v3084_v55  ;;  %v3092_v18 = vadd.f32 %v3091_v3, %v3090_v61  ;;  %v3101_v7 = vmax.f32 %v3099_v62, %v3100_v4  ;;  %v3107_v8 = vmax.f32 %v3105_v63, %v3106_v19 }
 0xdeb   : > { %v3094_v6 = vmul.f32 0.125, %v3086_v5  ;;  %v3095_v27 = vmul.f32 0.125, %v3092_v18 }
 0xded   : > { %v4351_v12 = vsel %vm3108_vm0, %v3094_v6, %v3101_v7  ;;  %v4353_v28 = vsel %vm3108_vm0, %v3095_v27, %v3107_v8 }
 0xdee   : > { %3121 = vrot.lane.b32.xlu0 %v4353_v28, %s3704_s8  ;;  %3119 = vrot.lane.b32.xlu1 %v4351_v12, %s3704_s8  ;;  %s4510_s8 = smov 111  }
 0xdf2   : > { %3145 = vrot.lane.b32.xlu0 %v4353_v28, %s3708_s16  ;;  %3143 = vrot.lane.b32.xlu1 %v4351_v12, %s3708_s16 }
 0xdf6   : > { %3129 = vrot.lane.b32.xlu0 %v4353_v28, %s3706_s10  ;;  %3127 = vrot.lane.b32.xlu1 %v4351_v12, %s3706_s10  ;;  %s4511_s10 = sld [smem:[#allocation7_spill]] }
 0xdfa   : > { %3153 = vrot.lane.b32.xlu0 %v4353_v28, %s4508_s26  ;;  %3151 = vrot.lane.b32.xlu1 %v4351_v12, %s4508_s26 }
 0xdfe   : > { %3113 = vrot.lane.b32.xlu0 %v4353_v28, %s4509_s0  ;;  %3111 = vrot.lane.b32.xlu1 %v4351_v12, %s4509_s0 }
 0xe02   : > { %3137 = vrot.lane.b32.xlu0 %v4353_v28, %s3707_s15  ;;  %3135 = vrot.lane.b32.xlu1 %v4351_v12, %s3707_s15  ;;  %s4512_s15 = sshll.u32 %s4514_s1, 4 }
 0xe03   : > { %s1100_s16 = scalar_lea.vmem %s3907_s6, %s4512_s15 }
 0xe06   : > { %3161 = vrot.lane.b32.xlu0 %v4353_v28, %s3710_s22  ;;  %3159 = vrot.lane.b32.xlu1 %v4351_v12, %s3710_s22 }
 0xe0a   : > { %3169 = vrot.lane.b32.xlu0 %v4353_v28, %s4510_s8  ;;  %3167 = vrot.lane.b32.xlu1 %v4351_v12, %s4510_s8 }
 0xe0e   : > { %3229 = vperm.xlu1 %3643, %v3226_v14  }
 0xe60   : > { %v3122_v16 = vpop.permute.xlu0 %3121  ;;  %v3120_v17 = vpop.permute.xlu1 %3119 }
 0xe61   : > { %v3124_v36 = vsel %vm1303_vm6, %v3122_v16, %v3120_v17  ;;  %v3123_v9 = vsel %vm1303_vm6, %v3120_v17, %v3122_v16  ;;  %vm3213_vm6 = vcmask 1043456  }
 0xe62   : > { %v3125_v26 = vmul.f32 %v3124_v36, %v4008_v31  ;;  %v3126_v11 = vmul.f32 %v3123_v9, %v4011_v32 }
 0xe64   : > { %v3146_v20 = vpop.permute.xlu0 %3145  ;;  %v3144_v29 = vpop.permute.xlu1 %3143  ;;  %v3177_v62 = vrot.slane %v3125_v26, 6 }
 0xe65   : > { %v3147_v10 = vsel %vm1371_vm11, %v3144_v29, %v3146_v20  ;;  %v3148_v58 = vsel %vm1371_vm11, %v3146_v20, %v3144_v29 }
 0xe66   : > { %v3149_v56 = vmul.f32 %v3147_v10, %v4071_v1  ;;  %v3150_v47 = vmul.f32 %v3148_v58, %v4044_v48 }
 0xe68   : > { %v3130_v30 = vpop.permute.xlu0 %3129  ;;  %v3128_v33 = vpop.permute.xlu1 %3127  ;;  %v3195_v63 = vrot.slane %v3149_v56, 6  ;;  %v3196_v3 = vrot.slane %v3150_v47, 6 }
 0xe69   : > { %v3132_v13 = vsel %vm1325_vm7, %v3130_v30, %v3128_v33  ;;  %v3131_v50 = vsel %vm1325_vm7, %v3128_v33, %v3130_v30  ;;  %vm3216_vm7 = vcmask 1045504  }
 0xe6a   : > { %v3133_v52 = vmul.f32 %v3132_v13, %v4064_v57  ;;  %v3134_v0 = vmul.f32 %v3131_v50, %v4034_v42  ;;  %v3219_v14 = vsel %vm2429_vm5, %v4351_v12, %v3195_v63  ;;  %v3220_v17 = vsel %vm2429_vm5, %v4353_v28, %v3196_v3 }
 0xe6c   : > { %v3154_v34 = vpop.permute.xlu0 %3153  ;;  %v3152_v35 = vpop.permute.xlu1 %3151  ;;  %v3184_v16 = vrot.slane %v3134_v0, 4 }
 0xe6d   : > { %v3155_v2 = vsel %vm1393_vm14, %v3152_v35, %v3154_v34  ;;  %v3156_v38 = vsel %vm1393_vm14, %v3154_v34, %v3152_v35 }
 0xe6e   : > { %v3157_v53 = vmul.f32 %v3155_v2, %v4089_v15  ;;  %v3158_v31 = vmul.f32 %v3156_v38, %v4093_v21  ;;  %v3178_v21 = vrot.slane %v3126_v11, 6  ;;  %v3225_v38 = vld [vmem:[%s4511_s10] sm:$0x1] }
 0xe70   : > { %v3114_v59 = vpop.permute.xlu0 %3113  ;;  %v3112_v60 = vpop.permute.xlu1 %3111  ;;  %v3201_v4 = vrot.slane %v3157_v53, 4  ;;  %v3202_v19 = vrot.slane %v3158_v31, 4 }
 0xe71   : > { %v3116_v46 = vsel %vm1278_vm8, %v3114_v59, %v3112_v60  ;;  %v3115_v49 = vsel %vm1278_vm8, %v3112_v60, %v3114_v59  ;;  %vm3236_vm8 = vcmask 146432  }
 0xe72   : > { %v3117_v32 = vmul.f32 %v3116_v46, %v4024_v39  ;;  %v3118_v61 = vmul.f32 %v3115_v49, %v4027_v40  ;;  %v3183_v39 = vrot.slane %v3133_v52, 4  ;;  %v3221_v35 = vsel %vm3213_vm6, %v3219_v14, %v3201_v4 }
 0xe73   : > { %v3222_v36 = vsel %vm3213_vm6, %v3220_v17, %v3202_v19 }
 0xe74   : > { %v3138_v54 = vpop.permute.xlu0 %3137  ;;  %v3136_v55 = vpop.permute.xlu1 %3135  ;;  %v3211_v6 = vsel %vm2429_vm5, %v3117_v32, %v3177_v62 }
 0xe75   : > { %v3139_v48 = vsel %vm1349_vm9, %v3136_v55, %v3138_v54  ;;  %v3140_v1 = vsel %vm1349_vm9, %v3138_v54, %v3136_v55  ;;  %v3214_v20 = vsel %vm3213_vm6, %v3211_v6, %v3183_v39 }
 0xe76   : > { %v3141_v57 = vmul.f32 %v3140_v1, %v4037_v43  ;;  %v3142_v15 = vmul.f32 %v3139_v48, %v4031_v41  ;;  %v3212_v43 = vsel %vm2429_vm5, %v3118_v61, %v3178_v21  ;;  %v3657_v21 = vld [vmem:[%s3926_s2 + $0x8] sm:$0xff] }
 0xe78   : > { %v3162_v5 = vpop.permute.xlu0 %3161  ;;  %v3160_v18 = vpop.permute.xlu1 %3159  ;;  %v3189_v27 = vrot.slane %v3141_v57, 2  ;;  %v3190_v7 = vrot.slane %v3142_v15, 2  ;;  %v3656_v15 = vld [vmem:[%s3926_s2] sm:$0xff] }
 0xe79   : > { %v3163_v40 = vsel %vm1417_vm15, %v3160_v18, %v3162_v5  ;;  %v3164_v41 = vsel %vm1417_vm15, %v3162_v5, %v3160_v18 }
 0xe7a   : > { %v3165_v42 = vmul.f32 %v3163_v40, %v4097_v22  ;;  %v3166_v8 = vmul.f32 %v3164_v41, %v4100_v24  ;;  %v3217_v22 = vsel %vm3216_vm7, %v3214_v20, %v3189_v27  ;;  %v3215_v24 = vsel %vm3213_vm6, %v3212_v43, %v3184_v16 }
 0xe7b   : > { %v3218_v9 = vsel %vm3216_vm7, %v3215_v24, %v3190_v7 }
 0xe7c   : > { %v3207_v29 = vrot.slane %v3165_v42, 2  ;;  %v3208_v30 = vrot.slane %v3166_v8, 2  ;;  %v3170_v33 = vpop.permute.xlu0 %3169  ;;  %v3168_v34 = vpop.permute.xlu1 %3167 }
 0xe7d   : > { %v3172_v28 = vsel %vm1439_vm1, %v3170_v33, %v3168_v34  ;;  %v3171_v60 = vsel %vm1439_vm1, %v3168_v34, %v3170_v33 }
 0xe7e   : > { %v3223_v12 = vsel %vm3216_vm7, %v3221_v35, %v3207_v29  ;;  %v3224_v10 = vsel %vm3216_vm7, %v3222_v36, %v3208_v30  ;;  %v3174_v13 = vmul.f32 %v3172_v28, %v4115_v37  ;;  %v3173_v2 = vmul.f32 %v3171_v60, %v4122_v51 }
 0xe7f   : > { %v3565_v58 = vpack.c.bf16 %v3224_v10, %v3218_v9  ;;  %v3567_v59 = vpack.c.bf16 %v3223_v12, %v3217_v22 }
 0xe81   : > { %3566 = vmatprep.subr.bf16.mxu1 %v3565_v58 }
 0xe82   : > { %3568 = vmatpush1.bf16.msra.mxu1 %v3567_v59 }
 0xe83   : > { %3490 = vmatprep.subr.msk.mxu1 %vm2429_vm5, %v3174_v13 }
 0xe86   : > { %3491 = vmatpush1.msk.msra.mxu1 %vm2429_vm5, %v3173_v2 }
 0xe87   : > { %3492 = vmatmul.mubr.msk.f32.vlgmr.msra.gmra.mrb[12].mxu1 %vm3236_vm8, %v3225_v38 }
 0xe8d   : > { %v3230_v26 = vpop.permute.xlu1 %3229 }
 0xe8e   : > { %v3235_v46 = vrot.slane %v3230_v26, %v3993_v25 }
 0xf5a   : > { %v3312_v11 = vpop.f32.mrb[12].mxu1 }
 0xf5b   : > { %v3313_v56 = vadd.f32 %v3312_v11, %v3235_v46  ;;  %v3314_v23 = vpop.f32.mrb[13].mxu1 }
 0xf5c   : > { %v3315_v47 = vadd.f32 %v3314_v23, %v3235_v46 }
 0xf5d   : > { %v3317_v49 = vsub.f32 0.0, %v3313_v56 }
 0xf5e   : > { %v3318_v37 = vsub.f32 0.0, %v3315_v47 }
 0xf5f   : > { %v3319_v50 = vmul.f32 1.442695, %v3317_v49 }
 0xf60   : > { %v3321_v52 = vmul.f32 1.442695, %v3318_v37 }
 0xf61   : > { %3648 = vpow2.f32 %v3319_v50 }
 0xf62   : > { %3650 = vpow2.f32 %v3321_v52 }
 0xf6b   : > { %v3649_v51 = vpop.eup %3648 }
 0xf6c   : > { %v3651_v53 = vpop.eup %3650  ;;  %v3323_v31 = vadd.f32 1.0, %v3649_v51 }
 0xf6d   : > { %v3324_v54 = vadd.f32 1.0, %v3651_v53 }
 0xf6e   : > { %3652 = vrcp.f32 %v3323_v31 }
 0xf6f   : > { %3654 = vrcp.f32 %v3324_v54 }
 0xf78   : > { %v3653_v55 = vpop.eup %3652 }
 0xf79   : > { %v3655_v32 = vpop.eup %3654  ;;  %v3332_v48 = vrot.slane %v3653_v55, %v3993_v25 }
 0xf7a   : > { %v3336_v1 = vrot.slane %v3655_v32, %v3993_v25 }
 0xf7b   : > { %v3337_v61 = vmul.f32 %v3332_v48, %v4341_v44 }
 0xf7c   : > { %v3338_v57 = vmul.f32 %v3336_v1, %v4343_v45 }
 0xf7d   : > { %v3339_v62 = vadd.f32 %v3656_v15, %v3337_v61 }
 0xf7e   : > { %v3340_v63 = vadd.f32 %v3657_v21, %v3338_v57 }
 0xf7f   : > { %v3341_v0 = vmax.f32 %v3339_v62, 0.0 }
 0xf80   : > { %v3342_v3 = vmax.f32 %v3340_v63, 0.0 }
 0xf81   : > { %3343 = vst [vmem:[%s1100_s16] sm:$0xff] %v3341_v0 }
 0xf82   : > { %3344 = vst [vmem:[%s1100_s16 + $0x8] sm:$0xff] %v3342_v3 }
 0xf83 PF: > { %s85_s28 = sadd.s32 1, %s3664_s28  }
 0xf84   : > { %p82_p4 = scmp.ge.s32.totalorder %s85_s28, 4  }
 0xf86   :  { %84 = sbr.rel (!%p82_p4) target bundleno = 58 (0x3a), region = 230 }

</bundles_post_ra>
